<compile_context>
chip_gen: v6e
topology: v6e:2x2x1
jax: 0.10.0
libtpu: 0.0.40
codegen_flags: <defaults>
</compile_context>

<pallas_src>
import functools

import jax
import jax.numpy as jnp
from jax.experimental import pallas as pl
from jax.experimental.pallas import tpu as pltpu

LOG2 = 0.6931471805599453


def _shifted_softplus(v):
    # Numerically stable softplus(v) - log(2): exactly one exp + one log1p per
    # element (one EUP push each), no extra compare/select chains.
    return jnp.maximum(v, 0.0) + jnp.log1p(jnp.exp(-jnp.abs(v))) - LOG2


def output_block_kernel(x_ref, w1_ref, b1_ref, w2_ref, b2_ref, wo_ref, o_ref,
                        *, vpu_matvec):
    # x tile: (TILE_N, F). Compute / residual accumulation in f32.
    x = x_ref[...].astype(jnp.float32)
    num_residual = w1_ref.shape[0]

    # num_residual is small and compile-time: static Python unroll.
    for i in range(num_residual):
        w1 = w1_ref[i]                      # (F, F) bf16, VMEM-resident
        b1 = b1_ref[i:i + 1, :]             # (1, F)  f32
        w2 = w2_ref[i]                      # (F, F) bf16, VMEM-resident
        b2 = b2_ref[i:i + 1, :]             # (1, F)  f32

        y = _shifted_softplus(x)
        h = _shifted_softplus(
            jnp.dot(y.astype(jnp.bfloat16), w1,
                    preferred_element_type=jnp.float32) + b1)
        x = x + jnp.dot(h.astype(jnp.bfloat16), w2,
                        preferred_element_type=jnp.float32) + b2

    x = _shifted_softplus(x)

    if vpu_matvec:
        # n_output == 1: VPU multiply + XLU lane reduction (free slots vs MXU).
        # wo_ref holds W_out.T, shape (1, F), f32.
        w = wo_ref[...]                                          # (1, F)
        o_ref[...] = jnp.sum(x * w, axis=-1, keepdims=True).astype(o_ref.dtype)
    else:
        o_ref[...] = jnp.dot(x.astype(jnp.bfloat16), wo_ref[...],
                             preferred_element_type=jnp.float32
                             ).astype(o_ref.dtype)


def output_block(x, w1, b1, w2, b2, w_out, *, tile_n=1024):
    n, f = x.shape
    r = w1.shape[0]
    n_output = w_out.shape[1]

    # Row tile: multiple of 8, no larger than the (8-padded) row count.
    tile_n = max(8, min(tile_n, ((n + 7) // 8) * 8))
    tile_n = (tile_n // 8) * 8
    n_pad = ((n + tile_n - 1) // tile_n) * tile_n
    if n_pad != n:
        # Padded rows flow through harmlessly (finite values) and are sliced off.
        x = jnp.pad(x, ((0, n_pad - n), (0, 0)))

    vpu_matvec = (n_output == 1)

    # bf16 MXU operands; biases stay f32 (added post-accumulation).
    w1b = w1.astype(jnp.bfloat16)
    w2b = w2.astype(jnp.bfloat16)
    b1f = b1.astype(jnp.float32)
    b2f = b2.astype(jnp.float32)
    if vpu_matvec:
        wo = jnp.transpose(w_out.astype(jnp.float32))            # (1, F) f32
        wo_spec = pl.BlockSpec((1, f), lambda i: (0, 0))
        wo_bytes = f * 4
    else:
        wo = w_out.astype(jnp.bfloat16)                          # (F, n_output)
        wo_spec = pl.BlockSpec((f, n_output), lambda i: (0, 0))
        wo_bytes = f * n_output * 2

    grid = (n_pad // tile_n,)

    # Advisory cost hint for XLA's scheduler around the custom call.
    matmul_flops = 4 * r * n_pad * f * f + 2 * n_pad * f * n_output
    transcendentals = (2 * r + 1) * n_pad * f * 2        # exp + log1p per act
    bytes_accessed = (n_pad * f * 4 + 2 * r * f * f * 2 + 2 * r * f * 4
                      + wo_bytes + n_pad * n_output * 4)

    out = pl.pallas_call(
        functools.partial(output_block_kernel, vpu_matvec=vpu_matvec),
        out_shape=jax.ShapeDtypeStruct((n_pad, n_output), jnp.float32),
        grid=grid,
        in_specs=[
            pl.BlockSpec((tile_n, f), lambda i: (i, 0)),         # x: streamed
            pl.BlockSpec((r, f, f), lambda i: (0, 0, 0)),        # W1: resident
            pl.BlockSpec((r, f), lambda i: (0, 0)),              # b1: resident
            pl.BlockSpec((r, f, f), lambda i: (0, 0, 0)),        # W2: resident
            pl.BlockSpec((r, f), lambda i: (0, 0)),              # b2: resident
            wo_spec,                                             # W_out: resident
        ],
        out_specs=pl.BlockSpec((tile_n, n_output), lambda i: (i, 0)),
        compiler_params=pltpu.CompilerParams(
            dimension_semantics=("parallel",),        # megacore sharding
            vmem_limit_bytes=32 * 1024 * 1024,        # safe on 64 MiB v7x
        ),
        cost_estimate=pl.CostEstimate(
            flops=matmul_flops,
            transcendentals=transcendentals,
            bytes_accessed=bytes_accessed),
    )(x, w1b, b1f, w2b, b2f, wo)

    return out[:n]


def reference_output_block(x, w1, b1, w2, b2, w_out):
    # Pure-JAX f32 reference (module semantics).
    x = x.astype(jnp.float32)
    for i in range(w1.shape[0]):
        y = _shifted_softplus(x)
        h = _shifted_softplus(y @ w1[i] + b1[i])
        x = x + h @ w2[i] + b2[i]
    x = _shifted_softplus(x)
    return x @ w_out


if __name__ == "__main__":
    # Small deterministic problem. F lane-full (128); N chosen so that with
    # tile_n=128 we exercise grid=3 and row padding (272 -> 384).
    N, F, NUM_RESIDUAL, N_OUTPUT = 272, 128, 2, 1

    key = jax.random.PRNGKey(0)
    kx, k1, kb1, k2, kb2, ko = jax.random.split(key, 6)

    x = jax.random.normal(kx, (N, F), dtype=jnp.float32)
    # NOTE: in the original module the output DenseLayer uses W_init=False
    # (zero-initialized weights); small random weights are used here so the
    # kernel's compute path is actually exercised.
    w1 = jax.random.normal(k1, (NUM_RESIDUAL, F, F), dtype=jnp.float32) * 0.1
    b1 = jax.random.normal(kb1, (NUM_RESIDUAL, F), dtype=jnp.float32) * 0.1
    w2 = jax.random.normal(k2, (NUM_RESIDUAL, F, F), dtype=jnp.float32) * 0.1
    b2 = jax.random.normal(kb2, (NUM_RESIDUAL, F), dtype=jnp.float32) * 0.1
    w_out = jax.random.normal(ko, (F, N_OUTPUT), dtype=jnp.float32) * 0.1

    out = output_block(x, w1, b1, w2, b2, w_out, tile_n=128)
    out = jax.block_until_ready(out)

    ref = reference_output_block(x, w1, b1, w2, b2, w_out)
    assert out.shape == (N, N_OUTPUT), out.shape
    # Tolerance loosened vs. pure-f32: MXU operands are bf16 (f32 accumulate).
    assert jnp.allclose(out, ref, atol=5e-2, rtol=5e-2), (
        float(jnp.max(jnp.abs(out - ref))))

    print("KERNEL_OK")
</pallas_src>

<mosaic_0001>
module attributes {stable_mosaic.version = 11 : i64} {
  func.func @output_block_kernel(%arg0: i32, %arg1: memref<128x128xf32, #tpu.memory_space<vmem>>, %arg2: memref<2x128x128xbf16, #tpu.memory_space<vmem>>, %arg3: memref<2x128xf32, #tpu.memory_space<vmem>>, %arg4: memref<2x128x128xbf16, #tpu.memory_space<vmem>>, %arg5: memref<2x128xf32, #tpu.memory_space<vmem>>, %arg6: memref<1x128xf32, #tpu.memory_space<vmem>>, %arg7: memref<128x1xf32, #tpu.memory_space<vmem>>) attributes {dimension_semantics = [#tpu.dimension_semantics<parallel>], iteration_bounds = array<i64: 3>, scalar_prefetch = 0 : i64, scratch_operands = 0 : i64, tpu.core_type = #tpu.core_type<tc>, window_params = [{transform_indices = @transform_0, window_bounds = array<i64: 128, 128>}, {pipeline_mode = #tpu.pipeline_mode<synchronous>, transform_indices = @transform_1, window_bounds = array<i64: 2, 128, 128>}, {pipeline_mode = #tpu.pipeline_mode<synchronous>, transform_indices = @transform_2, window_bounds = array<i64: 2, 128>}, {pipeline_mode = #tpu.pipeline_mode<synchronous>, transform_indices = @transform_3, window_bounds = array<i64: 2, 128, 128>}, {pipeline_mode = #tpu.pipeline_mode<synchronous>, transform_indices = @transform_4, window_bounds = array<i64: 2, 128>}, {pipeline_mode = #tpu.pipeline_mode<synchronous>, transform_indices = @transform_5, window_bounds = array<i64: 1, 128>}, {transform_indices = @transform_6, window_bounds = array<i64: 128, 1>}]} {
    %c0 = arith.constant 0 : index
    %c0_0 = arith.constant 0 : index
    %0 = vector.load %arg1[%c0, %c0_0] : memref<128x128xf32, #tpu.memory_space<vmem>>, vector<128x128xf32>
    %c0_1 = arith.constant 0 : index
    %c0_2 = arith.constant 0 : index
    %c0_3 = arith.constant 0 : index
    %1 = vector.load %arg2[%c0_1, %c0_2, %c0_3] : memref<2x128x128xbf16, #tpu.memory_space<vmem>>, vector<1x128x128xbf16>
    %2 = vector.shape_cast %1 : vector<1x128x128xbf16> to vector<128x128xbf16>
    %c0_4 = arith.constant 0 : index
    %c0_5 = arith.constant 0 : index
    %3 = vector.load %arg3[%c0_4, %c0_5] : memref<2x128xf32, #tpu.memory_space<vmem>>, vector<1x128xf32>
    %c0_6 = arith.constant 0 : index
    %c0_7 = arith.constant 0 : index
    %c0_8 = arith.constant 0 : index
    %4 = vector.load %arg4[%c0_6, %c0_7, %c0_8] : memref<2x128x128xbf16, #tpu.memory_space<vmem>>, vector<1x128x128xbf16>
    %5 = vector.shape_cast %4 : vector<1x128x128xbf16> to vector<128x128xbf16>
    %c0_9 = arith.constant 0 : index
    %c0_10 = arith.constant 0 : index
    %6 = vector.load %arg5[%c0_9, %c0_10] : memref<2x128xf32, #tpu.memory_space<vmem>>, vector<1x128xf32>
    %cst = arith.constant 0.000000e+00 : f32
    %7 = vector.broadcast %cst : f32 to vector<128x128xf32>
    %8 = arith.maximumf %0, %7 : vector<128x128xf32>
    %9 = math.absf %0 : vector<128x128xf32>
    %cst_11 = arith.constant 0.000000e+00 : f32
    %10 = vector.broadcast %cst_11 : f32 to vector<128x128xf32>
    %11 = arith.subf %10, %9 : vector<128x128xf32>
    %12 = math.exp %11 : vector<128x128xf32>
    %13 = math.log1p %12 : vector<128x128xf32>
    %14 = arith.addf %8, %13 : vector<128x128xf32>
    %cst_12 = arith.constant 0.693147182 : f32
    %15 = vector.broadcast %cst_12 : f32 to vector<128x128xf32>
    %16 = arith.subf %14, %15 : vector<128x128xf32>
    %17 = arith.truncf %16 : vector<128x128xf32> to vector<128x128xbf16>
    %cst_13 = arith.constant dense<0.000000e+00> : vector<128x128xf32>
    %18 = tpu.matmul %17, %2, %cst_13 {dimension_numbers = #tpu.dot_dimension_numbers<[1], [0], [0], [1], [0, 0, 1, 1], [], []>} : vector<128x128xbf16>, vector<128x128xbf16>, vector<128x128xf32> -> vector<128x128xf32>
    %19 = vector.broadcast %3 : vector<1x128xf32> to vector<128x128xf32>
    %20 = arith.addf %18, %19 : vector<128x128xf32>
    %cst_14 = arith.constant 0.000000e+00 : f32
    %21 = vector.broadcast %cst_14 : f32 to vector<128x128xf32>
    %22 = arith.maximumf %20, %21 : vector<128x128xf32>
    %23 = math.absf %20 : vector<128x128xf32>
    %cst_15 = arith.constant 0.000000e+00 : f32
    %24 = vector.broadcast %cst_15 : f32 to vector<128x128xf32>
    %25 = arith.subf %24, %23 : vector<128x128xf32>
    %26 = math.exp %25 : vector<128x128xf32>
    %27 = math.log1p %26 : vector<128x128xf32>
    %28 = arith.addf %22, %27 : vector<128x128xf32>
    %cst_16 = arith.constant 0.693147182 : f32
    %29 = vector.broadcast %cst_16 : f32 to vector<128x128xf32>
    %30 = arith.subf %28, %29 : vector<128x128xf32>
    %31 = arith.truncf %30 : vector<128x128xf32> to vector<128x128xbf16>
    %cst_17 = arith.constant dense<0.000000e+00> : vector<128x128xf32>
    %32 = tpu.matmul %31, %5, %cst_17 {dimension_numbers = #tpu.dot_dimension_numbers<[1], [0], [0], [1], [0, 0, 1, 1], [], []>} : vector<128x128xbf16>, vector<128x128xbf16>, vector<128x128xf32> -> vector<128x128xf32>
    %33 = arith.addf %0, %32 : vector<128x128xf32>
    %34 = vector.broadcast %6 : vector<1x128xf32> to vector<128x128xf32>
    %35 = arith.addf %33, %34 : vector<128x128xf32>
    %c1 = arith.constant 1 : index
    %c0_18 = arith.constant 0 : index
    %c0_19 = arith.constant 0 : index
    %36 = vector.load %arg2[%c1, %c0_18, %c0_19] : memref<2x128x128xbf16, #tpu.memory_space<vmem>>, vector<1x128x128xbf16>
    %37 = vector.shape_cast %36 : vector<1x128x128xbf16> to vector<128x128xbf16>
    %c1_20 = arith.constant 1 : index
    %c0_21 = arith.constant 0 : index
    %38 = vector.load %arg3[%c1_20, %c0_21] : memref<2x128xf32, #tpu.memory_space<vmem>>, vector<1x128xf32>
    %c1_22 = arith.constant 1 : index
    %c0_23 = arith.constant 0 : index
    %c0_24 = arith.constant 0 : index
    %39 = vector.load %arg4[%c1_22, %c0_23, %c0_24] : memref<2x128x128xbf16, #tpu.memory_space<vmem>>, vector<1x128x128xbf16>
    %40 = vector.shape_cast %39 : vector<1x128x128xbf16> to vector<128x128xbf16>
    %c1_25 = arith.constant 1 : index
    %c0_26 = arith.constant 0 : index
    %41 = vector.load %arg5[%c1_25, %c0_26] : memref<2x128xf32, #tpu.memory_space<vmem>>, vector<1x128xf32>
    %cst_27 = arith.constant 0.000000e+00 : f32
    %42 = vector.broadcast %cst_27 : f32 to vector<128x128xf32>
    %43 = arith.maximumf %35, %42 : vector<128x128xf32>
    %44 = math.absf %35 : vector<128x128xf32>
    %cst_28 = arith.constant 0.000000e+00 : f32
    %45 = vector.broadcast %cst_28 : f32 to vector<128x128xf32>
    %46 = arith.subf %45, %44 : vector<128x128xf32>
    %47 = math.exp %46 : vector<128x128xf32>
    %48 = math.log1p %47 : vector<128x128xf32>
    %49 = arith.addf %43, %48 : vector<128x128xf32>
    %cst_29 = arith.constant 0.693147182 : f32
    %50 = vector.broadcast %cst_29 : f32 to vector<128x128xf32>
    %51 = arith.subf %49, %50 : vector<128x128xf32>
    %52 = arith.truncf %51 : vector<128x128xf32> to vector<128x128xbf16>
    %cst_30 = arith.constant dense<0.000000e+00> : vector<128x128xf32>
    %53 = tpu.matmul %52, %37, %cst_30 {dimension_numbers = #tpu.dot_dimension_numbers<[1], [0], [0], [1], [0, 0, 1, 1], [], []>} : vector<128x128xbf16>, vector<128x128xbf16>, vector<128x128xf32> -> vector<128x128xf32>
    %54 = vector.broadcast %38 : vector<1x128xf32> to vector<128x128xf32>
    %55 = arith.addf %53, %54 : vector<128x128xf32>
    %cst_31 = arith.constant 0.000000e+00 : f32
    %56 = vector.broadcast %cst_31 : f32 to vector<128x128xf32>
    %57 = arith.maximumf %55, %56 : vector<128x128xf32>
    %58 = math.absf %55 : vector<128x128xf32>
    %cst_32 = arith.constant 0.000000e+00 : f32
    %59 = vector.broadcast %cst_32 : f32 to vector<128x128xf32>
    %60 = arith.subf %59, %58 : vector<128x128xf32>
    %61 = math.exp %60 : vector<128x128xf32>
    %62 = math.log1p %61 : vector<128x128xf32>
    %63 = arith.addf %57, %62 : vector<128x128xf32>
    %cst_33 = arith.constant 0.693147182 : f32
    %64 = vector.broadcast %cst_33 : f32 to vector<128x128xf32>
    %65 = arith.subf %63, %64 : vector<128x128xf32>
    %66 = arith.truncf %65 : vector<128x128xf32> to vector<128x128xbf16>
    %cst_34 = arith.constant dense<0.000000e+00> : vector<128x128xf32>
    %67 = tpu.matmul %66, %40, %cst_34 {dimension_numbers = #tpu.dot_dimension_numbers<[1], [0], [0], [1], [0, 0, 1, 1], [], []>} : vector<128x128xbf16>, vector<128x128xbf16>, vector<128x128xf32> -> vector<128x128xf32>
    %68 = arith.addf %35, %67 : vector<128x128xf32>
    %69 = vector.broadcast %41 : vector<1x128xf32> to vector<128x128xf32>
    %70 = arith.addf %68, %69 : vector<128x128xf32>
    %cst_35 = arith.constant 0.000000e+00 : f32
    %71 = vector.broadcast %cst_35 : f32 to vector<128x128xf32>
    %72 = arith.maximumf %70, %71 : vector<128x128xf32>
    %73 = math.absf %70 : vector<128x128xf32>
    %cst_36 = arith.constant 0.000000e+00 : f32
    %74 = vector.broadcast %cst_36 : f32 to vector<128x128xf32>
    %75 = arith.subf %74, %73 : vector<128x128xf32>
    %76 = math.exp %75 : vector<128x128xf32>
    %77 = math.log1p %76 : vector<128x128xf32>
    %78 = arith.addf %72, %77 : vector<128x128xf32>
    %cst_37 = arith.constant 0.693147182 : f32
    %79 = vector.broadcast %cst_37 : f32 to vector<128x128xf32>
    %80 = arith.subf %78, %79 : vector<128x128xf32>
    %c0_38 = arith.constant 0 : index
    %c0_39 = arith.constant 0 : index
    %81 = vector.load %arg6[%c0_38, %c0_39] : memref<1x128xf32, #tpu.memory_space<vmem>>, vector<1x128xf32>
    %82 = vector.broadcast %81 : vector<1x128xf32> to vector<128x128xf32>
    %83 = arith.mulf %80, %82 : vector<128x128xf32>
    %cst_40 = arith.constant dense<0.000000e+00> : vector<128xf32>
    %84 = vector.multi_reduction <add>, %83, %cst_40 [1] : vector<128x128xf32> to vector<128xf32>
    %85 = vector.shape_cast %84 : vector<128xf32> to vector<128x1xf32>
    %c0_41 = arith.constant 0 : index
    %c0_42 = arith.constant 0 : index
    %86 = vector.load %arg7[%c0_41, %c0_42] : memref<128x1xf32, #tpu.memory_space<vmem>>, vector<128x1xf32>
    tpu.vector_store %arg7[%c0_41, %c0_42], %85 {strides = array<i32>} : memref<128x1xf32, #tpu.memory_space<vmem>>, vector<128x1xf32>,
    return
  }
  func.func @transform_0(%arg0: i32) -> (i32, i32) {
    %c0_i32 = arith.constant 0 : i32
    %c0_i32_0 = arith.constant 0 : i32
    return %arg0, %c0_i32 : i32, i32
  }
  func.func @transform_1(%arg0: i32) -> (i32, i32, i32) {
    %c0_i32 = arith.constant 0 : i32
    %c0_i32_0 = arith.constant 0 : i32
    %c0_i32_1 = arith.constant 0 : i32
    %c0_i32_2 = arith.constant 0 : i32
    return %c0_i32, %c0_i32_0, %c0_i32_1 : i32, i32, i32
  }
  func.func @transform_2(%arg0: i32) -> (i32, i32) {
    %c0_i32 = arith.constant 0 : i32
    %c0_i32_0 = arith.constant 0 : i32
    %c0_i32_1 = arith.constant 0 : i32
    return %c0_i32, %c0_i32_0 : i32, i32
  }
  func.func @transform_3(%arg0: i32) -> (i32, i32, i32) {
    %c0_i32 = arith.constant 0 : i32
    %c0_i32_0 = arith.constant 0 : i32
    %c0_i32_1 = arith.constant 0 : i32
    %c0_i32_2 = arith.constant 0 : i32
    return %c0_i32, %c0_i32_0, %c0_i32_1 : i32, i32, i32
  }
  func.func @transform_4(%arg0: i32) -> (i32, i32) {
    %c0_i32 = arith.constant 0 : i32
    %c0_i32_0 = arith.constant 0 : i32
    %c0_i32_1 = arith.constant 0 : i32
    return %c0_i32, %c0_i32_0 : i32, i32
  }
  func.func @transform_5(%arg0: i32) -> (i32, i32) {
    %c0_i32 = arith.constant 0 : i32
    %c0_i32_0 = arith.constant 0 : i32
    %c0_i32_1 = arith.constant 0 : i32
    return %c0_i32, %c0_i32_0 : i32, i32
  }
  func.func @transform_6(%arg0: i32) -> (i32, i32) {
    %c0_i32 = arith.constant 0 : i32
    %c0_i32_0 = arith.constant 0 : i32
    return %arg0, %c0_i32 : i32, i32
  }
}

</mosaic_0001>

<bundles_post_ra>
// kernel: tpu_custom_call.1
= control target key start
LH: loop header
LB: loop body
LE: loop exit
PB: predicated region body
PF: predicated region fallthrough
CT: control target
= control target key end

     0   :  { %11 = vsyncpa [#allocation3], 0  ;;  %s4819_s0 = inlined_call_operand.hbm [shape: f32[384,128], index: 0, kind: input, shape index: {}]   ;;  %s4820_s1 = inlined_call_operand.hbm [shape: bf16[2,128,128], index: 1, kind: input, shape index: {}]   ;;  %s4821_s2 = inlined_call_operand.vmem [shape: f32[2,128], index: 2, kind: input, shape index: {}]   ;;  %s4822_s3 = inlined_call_operand.hbm [shape: bf16[2,128,128], index: 3, kind: input, shape index: {}]   ;;  %s4823_s4 = inlined_call_operand.vmem [shape: f32[2,128], index: 4, kind: input, shape index: {}]   ;;  %s4824_s5 = inlined_call_operand.vmem [shape: f32[1,128], index: 5, kind: input, shape index: {}]   ;;  %s4825_s6 = inlined_call_operand.vmem [shape: f32[384,1], index: 6, kind: output, shape index: {}]  }
   0x1   :  { %13 = vsyncpa [#allocation3 + $0x1], 0 }
   0x2   :  { %14 = vsyncpa [#allocation5], 0  ;;  %s3441_s21 = smov 0   ;;  %s3443_s22 = smov 0  }
   0x3   :  { %s3445_s23 = smov 0   ;;  %s3447_s24 = smov 0  }
   0x4 LB: > { %s2520_s25 = sadd.s32 4294967295, %s3397_s24   ;;  %p40_p0 = scmp.ne.s32.totalorder %s3389_s22, %s3385_s21  ;;  %s3397_s24 = sphi %s3447_s24, %s4941_s24   ;;  %s3393_s23 = sphi %s3445_s23, %s4940_s23   ;;  %s3389_s22 = sphi %s3443_s22, %s4939_s22   ;;  %s3385_s21 = sphi %s3441_s21, %s4938_s21  }
   0x5   : > { %p3463_p1 = scmp.eq.s32.totalorder %s2520_s25, 0  ;;  %p2522_p2 = scmp.ge.s32.totalorder %s3397_s24, 1 }
   0x6   : > { %p182_p3 = scmp.lt.s32.totalorder %s3397_s24, 4  ;;  %s3399_s29 = smov [#allocation4]  }
   0x7   : > { %s4830_s26 = scalar_select %p3463_p1, 1, 0 }
   0x8   : > { %p3471_p4 = por %p3463_p1, %p40_p0  ;;  %p3475_p5 = pnand %p2522_p2, %p182_p3 }
   0x9   : > { %s194_s30 = sshll.u32 %s3399_s29, 4  ;;  %s3400_s8 = smov [#allocation6]   ;;  %s195_s30 = int_to_ptr.vmem [resolvable:$true] %s194_s30 }
   0xa   : > { %s4831_s27 = scalar_select %p3471_p4, 1, 0 }
   0xb   : > { %s4832_s28 = scalar_select %p3475_p5, 1, 0 }
   0xc   : > { %p2857_p6 = pneg %p3475_p5  ;;  %s210_s9 = sshll.u32 %s3400_s8, 4  ;;  %s211_s9 = int_to_ptr.vmem [resolvable:$true] %s210_s9 }
   0xd   : > { %s3290_s10 = scalar_lea.vmem %s195_s30, 2048  ;;  %p3298_p12 = scmp.lt.s32.totalorder %s195_s30, %s195_s30 }
   0xe   : > { %p3483_p7 = pnand %p2857_p6, %p3463_p1  ;;  %p3291_p9 = scmp.ne.s32.totalorder %s195_s30, %s3290_s10 }
   0xf   : > { %p3299_p13 = scmp.lt.s32.totalorder %s3290_s10, %s3290_s10 }
  0x10   : > { %p3281_p8 = pneg %p3483_p7 }
  0x11   : > { %p3300_p0 = por %p3299_p13, %p3298_p12 }
  0x12   : > { %p3293_p10 = pnand %p3291_p9, %p3281_p8 }
  0x14   : > { %p3294_p11 = pneg %p3293_p10 }
  0x16   : > { %p3301_p2 = pnand %p3300_p0, %p3294_p11 }
  0x18   : > { %3304 = shalt.err (!%p3301_p2)
}
  0x19   : > { %s3401_s11 = smov 64   ;;  %s3402_s12 = smov 4  }
  0x1a   : > { %2860 = dma.hbm_to_vmem [thread:$0]  (!%p3483_p7), %s4820_s1, 2048, %s195_s30, [#allocation5], %s3401_s11, %s3401_s11, %s3402_s12  }
  0x1b   : > { %s3316_s15 = scalar_lea.vmem %s211_s9, 2048  ;;  %p3324_p10 = scmp.lt.s32.totalorder %s211_s9, %s211_s9 }
  0x1c   : > { %p3317_p3 = scmp.ne.s32.totalorder %s211_s9, %s3316_s15  ;;  %p3325_p1 = scmp.lt.s32.totalorder %s3316_s15, %s3316_s15 }
  0x1e   : > { %p3319_p6 = pnand %p3317_p3, %p3281_p8  ;;  %p3326_p12 = por %p3325_p1, %p3324_p10 }
  0x20   : > { %p3320_p9 = pneg %p3319_p6 }
  0x22   : > { %p3327_p11 = pnand %p3326_p12, %p3320_p9 }
  0x24   : > { %3330 = shalt.err (!%p3327_p11)
}
  0x25   : > { %2863 = dma.hbm_to_vmem [thread:$0]  (!%p3483_p7), %s4822_s3, 2048, %s211_s9, [#allocation5], %s3401_s11, %s3401_s11, %s3402_s12  }
  0x26   : > { %s3506_s18 = sadd.s32 1, %s3397_s24   ;;  %s27_s19 = sadd.s32 1, %s3393_s23 }
  0x27   : > { %s24_s20 = ssub.s32 %s3397_s24, %s3506_s18  ;;  %p34_p1 = scmp.ne.s32.totalorder %s3393_s23, %s3389_s22 }
  0x28   : > { %p25_p8 = scmp.eq.s32.totalorder %s24_s20, 0  ;;  %p35_p13 = scmp.eq.s32.totalorder %s3397_s24, 0 }
  0x29   : > { %p2870_p0 = scmp.lt.s32.totalorder %s3397_s24, 3  ;;  %s230_s21 = sand.u32 1, %s3393_s23  }
  0x2a   : > { %s3517_s29 = scalar_select %p25_p8, %s3393_s23, %s27_s19  }
  0x2b   : > { %p36_p2 = por %p35_p13, %p34_p1  ;;  %s2526_s30 = sshll.u32 %s230_s21, 7 }
  0x2c   : > { %s2654_s7 = sshll.u32 %s3397_s24, 11  ;;  %s234_s9 = scalar_lea.vmem [#allocation2], %s2526_s30 }
  0x2d   : > { %s3523_s13 = scalar_lea.hbm %s4819_s0, %s2654_s7  ;;  %s241_s11 = sshll.u32 %s234_s9, 4  ;;  %s3529_s11 = int_to_ptr.vmem [resolvable:$true] %s241_s11 }
  0x2e   : > { %p3525_p7 = pnand %p2870_p0, %p36_p2  ;;  %s3531_s14 = scalar_lea.sflag [#allocation3], %s230_s21 }
  0x2f   : > { %s3331_s15 = scalar_lea.hbm %s3523_s13, 2048  ;;  %s3336_s19 = scalar_lea.hbm %s4819_s0, 6144 }
  0x30   : > { %p3332_p3 = scmp.ne.s32.totalorder %s3523_s13, %s3331_s15  ;;  %p3333_p6 = pneg %p3525_p7 }
  0x31   : > { %p3337_p12 = scmp.lt.s32.totalorder %s3523_s13, %s4819_s0  ;;  %p3338_p11 = scmp.lt.s32.totalorder %s3336_s19, %s3331_s15 }
  0x32   : > { %p3334_p9 = pnand %p3333_p6, %p3332_p3 }
  0x33   : > { %p3339_p1 = por %p3338_p11, %p3337_p12 }
  0x34   : > { %p3335_p10 = pneg %p3334_p9 }
  0x36   : > { %p3340_p8 = pnand %p3339_p1, %p3335_p10 }
  0x38   : > { %3343 = shalt.err (!%p3340_p8)
}
  0x39   : > { %s3344_s21 = scalar_lea.vmem %s3529_s11, 2048  ;;  %s3403_s7 = smov [#allocation2]  }
  0x3a   : > { %p3345_p13 = scmp.ne.s32.totalorder %s3529_s11, %s3344_s21  ;;  %s3349_s8 = sshll.u32 %s3403_s7, 4  ;;  %s3350_s8 = int_to_ptr.vmem [resolvable:$false] %s3349_s8 }
  0x3b   : > { %s3351_s10 = scalar_lea.vmem %s3350_s8, 4096  ;;  %p3352_p3 = scmp.lt.s32.totalorder %s3529_s11, %s3350_s8 }
  0x3c   : > { %p3347_p0 = pnand %p3345_p13, %p3333_p6  ;;  %p3353_p9 = scmp.lt.s32.totalorder %s3351_s10, %s3344_s21 }
  0x3e   : > { %p3348_p2 = pneg %p3347_p0  ;;  %p3354_p4 = por %p3353_p9, %p3352_p3 }
  0x40   : > { %p3355_p5 = pnand %p3354_p4, %p3348_p2 }
  0x42   : > { %3358 = shalt.err (!%p3355_p5)
}
  0x43   : > { %s3404_s9 = smov 128   ;;  %s3405_s15 = smov 8  }
  0x44   : > { %2867 = dma.hbm_to_vmem [thread:$0]  (!%p3525_p7), %s3523_s13, 2048, %s3529_s11, %s3531_s14, %s3404_s9, %s3404_s9, %s3405_s15  }
  0x45   : > { %p4835_p6 = scmp.ne.s32.totalorder %s4832_s28, 0 }
  0x46   : > { %s255_s16 = sand.u32 (!%p4835_p6), 1, %s3389_s22   ;;  %p4836_p4 = scmp.ne.s32.totalorder (!%p4835_p6), %s4831_s27, 0 }
  0x47   : > { %253 = sbr.rel (%p4835_p6) target bundleno = 1335 (0x537), region = 44  ;;  %s2530_s17 = sshll.u32 (!%p4835_p6), %s255_s16, 7 }
  0x48   : > { %s256_s19 = scalar_lea.sflag (!%p4835_p6), [#allocation3], %s255_s16  ;;  %s3555_s20 = scalar_lea.vmem (!%p4835_p6), [#allocation2], %s2530_s17 }
  0x4c   : > { %3376 = dma.done.wait (%p4836_p4), %s256_s19, 2048  }
  0x4d   : > { %3378 = vsyncadd (%p4836_p4), %s256_s19, 4294965248  ;;  %p4837_p5 = scmp.ne.s32.totalorder %s4830_s26, 0 }
  0x4f   : > { %3380 = dma.done.wait (%p4837_p5), [#allocation5], 4096  }
  0x50   : > { %3382 = vsyncadd (%p4837_p5), [#allocation5], 4294963200  ;;  %v2911_v0 = vld [vmem:[#allocation4 + $0x38] sm:$0xff]   ;;  %v2912_v1 = vld [vmem:[#allocation4 + $0x30] sm:$0xff]   ;;  %s2533_s8 = sshll.u32 %s2520_s25, 4 }
  0x51   : > { %2719 = vmatprep.subr.bf16.mxu0 %v2911_v0  ;;  %v2913_v2 = vld [vmem:[#allocation4 + $0x28] sm:$0xff]   ;;  %v2914_v3 = vld [vmem:[#allocation4 + $0x20] sm:$0xff]   ;;  %v3572_v6 = vld [vmem:[%s3555_s20 + $0x10] sm:$0xff]  ;;  %p298_p7 = scmp.lt.s32.totalorder %s2533_s8, 47 }
  0x52   : > { %2720 = vmatpush3.bf16.msra.mxu0 %v2911_v0  ;;  %v3566_v4 = vld [vmem:[%s3555_s20] sm:$0xff]  ;;  %v3569_v5 = vld [vmem:[%s3555_s20 + $0x8] sm:$0xff]  ;;  %v3577_v9 = vld [vmem:[%s3555_s20 + $0x18] sm:$0xff]  ;;  %v372_v10 = vand.u32 2147483647, %v3572_v6  ;;  %v356_v60 = vmax.f32 %v3572_v6, 0.0 }
  0x53   : > { %2721 = vmatprep.subr.bf16.mxu0 %v2912_v1  ;;  %v370_v7 = vand.u32 2147483647, %v3566_v4  ;;  %v371_v8 = vand.u32 2147483647, %v3569_v5  ;;  %v3581_v11 = vld [vmem:[%s3555_s20 + $0x20] sm:$0xff]  ;;  %v3585_v15 = vld [vmem:[%s3555_s20 + $0x28] sm:$0xff] }
  0x54   : > { %v373_v14 = vand.u32 2147483647, %v3577_v9  ;;  %v2915_v16 = vld [vmem:[#allocation4 + $0x18] sm:$0xff]   ;;  %v388_v17 = vsub.f32 0.0, %v372_v10  ;;  %v374_v18 = vand.u32 2147483647, %v3581_v11 }
  0x55   : > { %v386_v12 = vsub.f32 0.0, %v370_v7  ;;  %v387_v13 = vsub.f32 0.0, %v371_v8  ;;  %v3589_v19 = vld [vmem:[%s3555_s20 + $0x30] sm:$0xff]  ;;  %v3592_v20 = vld [vmem:[%s3555_s20 + $0x38] sm:$0xff]  ;;  %v375_v25 = vand.u32 2147483647, %v3585_v15 }
  0x56   : > { %2722 = vmatpush3.bf16.msra.mxu0 %v2912_v1  ;;  %v389_v23 = vsub.f32 0.0, %v373_v14  ;;  %v406_v24 = vmul.f32 1.442695, %v388_v17  ;;  %v390_v26 = vsub.f32 0.0, %v374_v18  ;;  %v376_v28 = vand.u32 2147483647, %v3589_v19 }
  0x57   : > { %2723 = vmatprep.subr.bf16.mxu0 %v2913_v2  ;;  %v402_v21 = vmul.f32 1.442695, %v386_v12  ;;  %v404_v22 = vmul.f32 1.442695, %v387_v13  ;;  %v377_v29 = vand.u32 2147483647, %v3592_v20 }
  0x58   : > { %v408_v27 = vmul.f32 1.442695, %v389_v23  ;;  %v2916_v30 = vld [vmem:[#allocation4 + $0x10] sm:$0xff]   ;;  %v391_v31 = vsub.f32 0.0, %v375_v25  ;;  %v410_v32 = vmul.f32 1.442695, %v390_v26 }
  0x59   : > { %2943 = vpow2.f32 %v402_v21  ;;  %v3598_v33 = vld [vmem:[%s3555_s20 + $0x40] sm:$0xff]  ;;  %v3601_v34 = vld [vmem:[%s3555_s20 + $0x48] sm:$0xff]  ;;  %v392_v35 = vsub.f32 0.0, %v376_v28  ;;  %v393_v36 = vsub.f32 0.0, %v377_v29  ;;  %v3605_v39 = vld [vmem:[%s3555_s20 + $0x50] sm:$0xff]  ;;  %v354_v51 = vmax.f32 %v3566_v4, 0.0 }
  0x5a   : > { %2724 = vmatpush3.bf16.msra.mxu0 %v2913_v2  ;;  %2945 = vpow2.f32 %v404_v22  ;;  %v412_v37 = vmul.f32 1.442695, %v391_v31  ;;  %v378_v38 = vand.u32 2147483647, %v3598_v33  ;;  %v3608_v40 = vld [vmem:[%s3555_s20 + $0x58] sm:$0xff]  ;;  %v2917_v41 = vld [vmem:[#allocation4 + $0x8] sm:$0xff]  }
  0x5b   : > { %2725 = vmatprep.subr.bf16.mxu0 %v2914_v3  ;;  %2947 = vpow2.f32 %v406_v24  ;;  %v414_v42 = vmul.f32 1.442695, %v392_v35  ;;  %v379_v43 = vand.u32 2147483647, %v3601_v34  ;;  %v416_v44 = vmul.f32 1.442695, %v393_v36 }
  0x5c   : > { %2949 = vpow2.f32 %v408_v27  ;;  %v394_v45 = vsub.f32 0.0, %v378_v38  ;;  %v3612_v46 = vld [vmem:[%s3555_s20 + $0x60] sm:$0xff]  ;;  %v380_v48 = vand.u32 2147483647, %v3605_v39  ;;  %v381_v49 = vand.u32 2147483647, %v3608_v40 }
  0x5d   : > { %2951 = vpow2.f32 %v410_v32  ;;  %v395_v47 = vsub.f32 0.0, %v379_v43  ;;  %v3617_v50 = vld [vmem:[%s3555_s20 + $0x68] sm:$0xff]  ;;  %v2918_v53 = vld [vmem:[#allocation4] sm:$0xff]   ;;  %v355_v54 = vmax.f32 %v3569_v5, 0.0  ;;  %v382_v57 = vand.u32 2147483647, %v3612_v46 }
  0x5e   : > { %2726 = vmatpush3.bf16.msra.mxu0 %v2914_v3  ;;  %2953 = vpow2.f32 %v412_v37  ;;  %v418_v52 = vmul.f32 1.442695, %v394_v45  ;;  %v396_v55 = vsub.f32 0.0, %v380_v48  ;;  %v397_v56 = vsub.f32 0.0, %v381_v49  ;;  %v3627_v0 = vld [vmem:[%s3555_s20 + $0x70] sm:$0xff]  ;;  %v3631_v7 = vld [vmem:[%s3555_s20 + $0x78] sm:$0xff] }
  0x5f   : > { %2727 = vmatprep.subr.bf16.mxu0 %v2915_v16  ;;  %2955 = vpow2.f32 %v414_v42  ;;  %v420_v58 = vmul.f32 1.442695, %v395_v47  ;;  %v383_v59 = vand.u32 2147483647, %v3617_v50  ;;  %v357_v61 = vmax.f32 %v3577_v9, 0.0  ;;  %s4943_s8 = smov (!%p298_p7, %s2533_s8), 47 }
  0x60   : > { %2957 = vpow2.f32 %v416_v44  ;;  %v358_v62 = vmax.f32 %v3581_v11, 0.0  ;;  %v422_v63 = vmul.f32 1.442695, %v396_v55  ;;  %v359_v1 = vmax.f32 %v3585_v15, 0.0  ;;  %s2534_s10 = sshll.u32 %s4943_s8, 3 }
  0x61   : > { %2959 = vpow2.f32 %v418_v52  ;;  %v424_v2 = vmul.f32 1.442695, %v397_v56  ;;  %v398_v3 = vsub.f32 0.0, %v382_v57  ;;  %v399_v10 = vsub.f32 0.0, %v383_v59  ;;  %s4772_s16 = scalar_lea.vmem %s4825_s6, %s2534_s10 }
  0x62   : > { %2728 = vmatpush3.bf16.msra.mxu0 %v2915_v16  ;;  %2961 = vpow2.f32 %v420_v58  ;;  %v384_v16 = vand.u32 2147483647, %v3627_v0  ;;  %v385_v22 = vand.u32 2147483647, %v3631_v7 }
  0x63   : > { %2729 = vmatprep.subr.bf16.mxu0 %v2916_v30  ;;  %2963 = vpow2.f32 %v422_v63  ;;  %v426_v26 = vmul.f32 1.442695, %v398_v3 }
  0x64   : > { %2965 = vpow2.f32 %v424_v2  ;;  %v3643_v44 = vsub.f32 0.0, %v384_v16  ;;  %v3645_v45 = vsub.f32 0.0, %v385_v22 }
  0x66   : > { %2730 = vmatpush3.bf16.msra.mxu0 %v2916_v30  ;;  %v2944_v12 = vpop.eup %2943  ;;  %v428_v30 = vmul.f32 1.442695, %v399_v10 }
  0x67   : > { %2731 = vmatprep.subr.bf16.mxu0 %v2917_v41  ;;  %v2946_v17 = vpop.eup %2945  ;;  %v434_v18 = vadd.f32 1.0, %v2944_v12  ;;  %v437_v21 = vmul.f32 -0.5, %v2944_v12  ;;  %v440_v35 = vand.u32 2147483647, %v2944_v12 }
  0x68   : > { %v2948_v23 = vpop.eup %2947  ;;  %v443_v24 = vadd.f32 1.0, %v2946_v17  ;;  %v446_v28 = vmul.f32 -0.5, %v2946_v17  ;;  %v449_v37 = vand.u32 2147483647, %v2946_v17 }
  0x69   : > { %v2950_v27 = vpop.eup %2949  ;;  %2967 = vlog2.f32 %v434_v18  ;;  %v452_v29 = vadd.f32 1.0, %v2948_v23  ;;  %v438_v32 = vadd.f32 1.0, %v437_v21  ;;  %v455_v38 = vmul.f32 -0.5, %v2948_v23 }
  0x6a   : > { %2732 = vmatpush3.bf16.msra.mxu0 %v2917_v41  ;;  %v3639_v31 = vpop.eup %2951  ;;  %2969 = vlog2.f32 %v443_v24  ;;  %v461_v41 = vadd.f32 1.0, %v2950_v27  ;;  %v447_v48 = vadd.f32 1.0, %v446_v28  ;;  %v464_v49 = vmul.f32 -0.5, %v2950_v27 }
  0x6b   : > { %2733 = vmatprep.subr.bf16.mxu0 %v2918_v53  ;;  %2971 = vlog2.f32 %v452_v29  ;;  %v2954_v42 = vpop.eup %2953  ;;  %v470_v52 = vadd.f32 1.0, %v3639_v31  ;;  %vm3648_vm0 = vcmp.lt.f32.partialorder %v440_v35, 0.0004427343  ;;  %v458_v56 = vand.u32 2147483647, %v2948_v23 }
  0x6c   : > { %2973 = vpow2.f32 %v426_v26  ;;  %v2956_v47 = vpop.eup %2955  ;;  %vm3652_vm1 = vcmp.lt.f32.partialorder %v449_v37, 0.0004427343  ;;  %v456_v59 = vadd.f32 1.0, %v455_v38  ;;  %v473_v63 = vmul.f32 -0.5, %v3639_v31 }
  0x6d   : > { %2975 = vlog2.f32 %v461_v41  ;;  %v2958_v57 = vpop.eup %2957  ;;  %v479_v2 = vadd.f32 1.0, %v2954_v42  ;;  %v467_v3 = vand.u32 2147483647, %v2950_v27  ;;  %v476_v10 = vand.u32 2147483647, %v3639_v31 }
  0x6e   : > { %2734 = vmatpush3.bf16.msra.mxu0 %v2918_v53  ;;  %v439_v53 = vmul.f32 %v2944_v12, %v438_v32  ;;  %2977 = vpow2.f32 %v428_v30  ;;  %v482_v12 = vmul.f32 -0.5, %v2954_v42  ;;  %v488_v16 = vadd.f32 1.0, %v2956_v47  ;;  %v3658_v18 = vpop.eup %2959 }
  0x6f   : > { %2979 = vlog2.f32 %v470_v52  ;;  %v448_v21 = vmul.f32 %v2946_v17, %v447_v48  ;;  %v465_v22 = vadd.f32 1.0, %v464_v49  ;;  %v491_v24 = vmul.f32 -0.5, %v2956_v47  ;;  %v3664_v30 = vpop.eup %2961 }
  0x70   : > { %2981 = vlog2.f32 %v479_v2  ;;  %vm3660_vm2 = vcmp.lt.f32.partialorder %v458_v56, 0.0004427343  ;;  %v485_v28 = vand.u32 2147483647, %v2954_v42  ;;  %v497_v29 = vadd.f32 1.0, %v2958_v57  ;;  %v3666_v41 = vpop.eup %2963 }
  0x71   : > { %2983 = vlog2.f32 %v488_v16  ;;  %v457_v32 = vmul.f32 %v2948_v23, %v456_v59  ;;  %v474_v35 = vadd.f32 1.0, %v473_v63  ;;  %v494_v37 = vand.u32 2147483647, %v2956_v47  ;;  %v3673_v52 = vpop.eup %2965 }
  0x72   : > { %v500_v38 = vmul.f32 -0.5, %v2958_v57  ;;  %vm3668_vm3 = vcmp.lt.f32.partialorder %v467_v3, 0.0004427343  ;;  %v483_v48 = vadd.f32 1.0, %v482_v12  ;;  %2985 = vlog2.f32 %v497_v29 }
  0x73   : > { %v506_v49 = vadd.f32 1.0, %v3658_v18  ;;  %v466_v56 = vmul.f32 %v2950_v27, %v465_v22  ;;  %vm3675_vm4 = vcmp.lt.f32.partialorder %v476_v10, 0.0004427343  ;;  %v492_v23 = vadd.f32 1.0, %v491_v24 }
  0x74   : > { %v503_v59 = vand.u32 2147483647, %v2958_v57  ;;  %vm3679_vm5 = vcmp.lt.f32.partialorder %v485_v28, 0.0004427343  ;;  %v501_v3 = vadd.f32 1.0, %v500_v38  ;;  %v509_v12 = vmul.f32 -0.5, %v3658_v18 }
  0x75   : > { %2987 = vlog2.f32 %v506_v49  ;;  %v515_v29 = vadd.f32 1.0, %v3664_v30  ;;  %v475_v27 = vmul.f32 %v3639_v31, %v474_v35  ;;  %vm3686_vm6 = vcmp.lt.f32.partialorder %v494_v37, 0.0004427343 }
  0x76   : > { %v2968_v63 = vpop.eup %2967  ;;  %v512_v22 = vand.u32 2147483647, %v3658_v18  ;;  %v484_v25 = vmul.f32 %v2954_v42, %v483_v48  ;;  %v518_v38 = vmul.f32 -0.5, %v3664_v30  ;;  %v493_v13 = vmul.f32 %v2956_v47, %v492_v23 }
  0x77   : > { %v2970_v43 = vpop.eup %2969  ;;  %v436_v36 = vmul.f32 0.6931472, %v2968_v63  ;;  %2989 = vlog2.f32 %v515_v29  ;;  %v524_v31 = vadd.f32 1.0, %v3666_v41  ;;  %v502_v42 = vmul.f32 %v2958_v57, %v501_v3 }
  0x78   : > { %v2972_v24 = vpop.eup %2971  ;;  %v445_v28 = vmul.f32 0.6931472, %v2970_v43  ;;  %vm3701_vm7 = vcmp.lt.f32.partialorder %v503_v59, 0.0004427343  ;;  %v510_v29 = vadd.f32 1.0, %v509_v12  ;;  %v519_v57 = vadd.f32 1.0, %v518_v38 }
  0x79   : > { %v3692_v49 = vpop.eup %2973  ;;  %v442_v14 = vsel %vm3648_vm0, %v439_v53, %v436_v36  ;;  %v454_v63 = vmul.f32 0.6931472, %v2972_v24  ;;  %vm3711_vm8 = vcmp.lt.f32.partialorder %v512_v22, 0.0004427343  ;;  %2991 = vlog2.f32 %v524_v31 }
  0x7a   : > { %v2976_v35 = vpop.eup %2975  ;;  %v451_v37 = vsel %vm3652_vm1, %v448_v21, %v445_v28  ;;  %v578_v43 = vadd.f32 %v442_v14, %v354_v51  ;;  %v527_v58 = vmul.f32 -0.5, %v3666_v41  ;;  %v533_v26 = vadd.f32 1.0, %v3673_v52 }
  0x7b   : > { %v3705_v8 = vpop.eup %2977  ;;  %v579_v36 = vadd.f32 %v451_v37, %v355_v54  ;;  %v460_v47 = vsel %vm3660_vm2, %v457_v32, %v454_v63  ;;  %v463_v53 = vmul.f32 0.6931472, %v2976_v35  ;;  %v511_v3 = vmul.f32 %v3658_v18, %v510_v29 }
  0x7c   : > { %v2980_v4 = vpop.eup %2979  ;;  %v2535_v51 = vadd.f32 -0.6931472, %v578_v43  ;;  %v580_v14 = vadd.f32 %v460_v47, %v356_v60  ;;  %v521_v6 = vand.u32 2147483647, %v3664_v30  ;;  %2993 = vlog2.f32 %v533_v26 }
  0x7d   : > { %v2536_v21 = vadd.f32 -0.6931472, %v579_v36  ;;  %v469_v5 = vsel %vm3668_vm3, %v466_v56, %v463_v53  ;;  %v472_v54 = vmul.f32 0.6931472, %v2980_v4  ;;  %v2982_v32 = vpop.eup %2981  ;;  %v520_v9 = vmul.f32 %v3664_v30, %v519_v57 }
  0x7e   : > { %v581_v23 = vadd.f32 %v469_v5, %v357_v61  ;;  %v2537_v59 = vadd.f32 -0.6931472, %v580_v14  ;;  %v2984_v60 = vpop.eup %2983  ;;  %v481_v24 = vmul.f32 0.6931472, %v2982_v32  ;;  %v528_v38 = vadd.f32 1.0, %v527_v58 }
  0x7f   : > { %v610_v12 = vpack.c.bf16 %v2536_v21, %v2535_v51  ;;  %v478_v22 = vsel %vm3675_vm4, %v475_v27, %v472_v54  ;;  %v490_v28 = vmul.f32 0.6931472, %v2984_v60  ;;  %v2986_v61 = vpop.eup %2985  ;;  %v530_v63 = vand.u32 2147483647, %v3666_v41 }
  0x80   : > { %v2538_v17 = vadd.f32 -0.6931472, %v581_v23  ;;  %v582_v56 = vadd.f32 %v478_v22, %v358_v62  ;;  %v487_v18 = vsel %vm3679_vm5, %v484_v25, %v481_v24  ;;  %v542_v2 = vadd.f32 1.0, %v3692_v49 }
  0x81   : > { %2735 = vmatprep.mubr.bf16.mxu0 %v610_v12  ;;  %v583_v31 = vadd.f32 %v487_v18, %v359_v1  ;;  %v496_v11 = vsel %vm3686_vm6, %v493_v13, %v490_v28  ;;  %v499_v30 = vmul.f32 0.6931472, %v2986_v61  ;;  %v4856_v37 = vmax.f32 %v3589_v19, 0.0 }
  0x82   : > { %v611_v27 = vpack.c.bf16 %v2538_v17, %v2537_v59  ;;  %v2539_v35 = vadd.f32 -0.6931472, %v582_v56  ;;  %v2988_v62 = vpop.eup %2987  ;;  %v536_v25 = vmul.f32 -0.5, %v3673_v52  ;;  %v539_v16 = vand.u32 2147483647, %v3673_v52 }
  0x83   : > { %v584_v43 = vadd.f32 %v496_v11, %v4856_v37  ;;  %v2540_v29 = vadd.f32 -0.6931472, %v583_v31  ;;  %v508_v36 = vmul.f32 0.6931472, %v2988_v62  ;;  %2995 = vlog2.f32 %v542_v2 }
  0x84   : > { %2736 = vmatmul.mubr.bf16.vlgmr.msra.gmra.mxu0 %v611_v27  ;;  %v545_v15 = vmul.f32 -0.5, %v3692_v49  ;;  %v2990_v1 = vpop.eup %2989  ;;  %v505_v10 = vsel %vm3701_vm7, %v502_v42, %v499_v30  ;;  %vm3745_vm9 = vcmp.lt.f32.partialorder %v521_v6, 0.0004427343  ;;  %v529_v19 = vmul.f32 %v3666_v41, %v528_v38 }
  0x85   : > { %v2541_v13 = vadd.f32 -0.6931472, %v584_v43  ;;  %v612_v53 = vpack.c.bf16 %v2540_v29, %v2539_v35  ;;  %v4859_v4 = vmax.f32 %v3592_v20, 0.0  ;;  %v514_v14 = vsel %vm3711_vm8, %v511_v3, %v508_v36 }
  0x86   : > { %v517_v57 = vmul.f32 0.6931472, %v2990_v1  ;;  %v4860_v58 = vmax.f32 %v3598_v33, 0.0  ;;  %vm3756_vm10 = vcmp.lt.f32.partialorder %v530_v63, 0.0004427343  ;;  %v537_v48 = vadd.f32 1.0, %v536_v25  ;;  %v2992_v54 = vpop.eup %2991 }
  0x87   : > { %v585_v51 = vadd.f32 %v505_v10, %v4859_v4  ;;  %v551_v5 = vadd.f32 1.0, %v3705_v8  ;;  %2739 = vmatprep.mubr.bf16.mxu0 %v612_v53  ;;  %vm3763_vm11 = vcmp.lt.f32.partialorder %v539_v16, 0.0004427343  ;;  %v546_v26 = vadd.f32 1.0, %v545_v15 }
  0x88   : > { %v586_v21 = vadd.f32 %v514_v14, %v4860_v58  ;;  %v523_v20 = vsel %vm3745_vm9, %v520_v9, %v517_v57  ;;  %v4865_v33 = vmax.f32 %v3601_v34, 0.0  ;;  %v526_v59 = vmul.f32 0.6931472, %v2992_v54 }
  0x89   : > { %v2542_v41 = vadd.f32 -0.6931472, %v585_v51  ;;  %2997 = vlog2.f32 %v551_v5  ;;  %v548_v6 = vand.u32 2147483647, %v3692_v49  ;;  %v554_v60 = vmul.f32 -0.5, %v3705_v8  ;;  %v2994_v34 = vpop.eup %2993 }
  0x8a   : > { %v587_v32 = vadd.f32 %v523_v20, %v4865_v33  ;;  %v2543_v23 = vadd.f32 -0.6931472, %v586_v21  ;;  %v430_v12 = vmul.f32 1.442695, %v3643_v44  ;;  %v532_v24 = vsel %vm3756_vm10, %v529_v19, %v526_v59  ;;  %v2919_v59 = vld [vmem:[#allocation6 + $0x38] sm:$0xff]  }
  0x8b   : > { %v613_v3 = vpack.c.bf16 %v2542_v41, %v2541_v13  ;;  %v538_v17 = vmul.f32 %v3673_v52, %v537_v48  ;;  %v432_v56 = vmul.f32 1.442695, %v3645_v45  ;;  %v4866_v28 = vmax.f32 %v3605_v39, 0.0  ;;  %2751 = vmatprep.subr.bf16.mxu1 %v2919_v59 }
  0x8c   : > { %v2544_v22 = vadd.f32 -0.6931472, %v587_v32  ;;  %2999 = vpow2.f32 %v430_v12  ;;  %v535_v18 = vmul.f32 0.6931472, %v2994_v34  ;;  %v4867_v38 = vmax.f32 %v3608_v40, 0.0  ;;  %2752 = vmatpush3.bf16.msra.mxu1 %v2919_v59  ;;  %v2925_v12 = vld [vmem:[#allocation6 + $0x8] sm:$0xff]  }
  0x8d   : > { %2740 = vmatmul.mubr.bf16.gmra.mxu0 %v613_v3  ;;  %v588_v9 = vadd.f32 %v532_v24, %v4866_v28  ;;  %3001 = vpow2.f32 %v432_v56  ;;  %v547_v52 = vmul.f32 %v3692_v49, %v546_v26  ;;  %v366_v27 = vmax.f32 %v3612_v46, 0.0  ;;  %v2921_v3 = vld [vmem:[#allocation6 + $0x28] sm:$0xff]   ;;  %v3792_v24 = vld [vmem:[%s4821_s2] ss:$0 sm:$0xff] }
  0x8e   : > { %v614_v61 = vpack.c.bf16 %v2544_v22, %v2543_v23  ;;  %v541_v44 = vsel %vm3763_vm11, %v538_v17, %v535_v18  ;;  %vm549_vm12 = vcmp.lt.f32.partialorder %v548_v6, 0.0004427343  ;;  %v555_v39 = vadd.f32 1.0, %v554_v60  ;;  %v2923_v6 = vld [vmem:[#allocation6 + $0x18] sm:$0xff]   ;;  %v2924_v60 = vld [vmem:[#allocation6 + $0x10] sm:$0xff]   ;;  %v2926_v22 = vld [vmem:[#allocation6] sm:$0xff]  }
  0x8f   : > { %v589_v63 = vadd.f32 %v541_v44, %v4867_v38  ;;  %v2545_v2 = vadd.f32 -0.6931472, %v588_v9  ;;  %v557_v11 = vand.u32 2147483647, %v3705_v8  ;;  %v367_v40 = vmax.f32 %v3617_v50, 0.0 }
  0x90   : > { %2743 = vmatprep.mubr.bf16.mxu0 %v614_v61  ;;  %v2996_v45 = vpop.eup %2995  ;;  %v556_v37 = vmul.f32 %v3705_v8, %v555_v39  ;;  %v368_v58 = vmax.f32 %v3627_v0, 0.0  ;;  %v369_v48 = vmax.f32 %v3631_v7, 0.0  ;;  %v2920_v0 = vld [vmem:[#allocation6 + $0x30] sm:$0xff]   ;;  %v2922_v7 = vld [vmem:[#allocation6 + $0x20] sm:$0xff]  }
  0x91   : > { %v2546_v31 = vadd.f32 -0.6931472, %v589_v63  ;;  %v544_v35 = vmul.f32 0.6931472, %v2996_v45  ;;  %vm558_vm13 = vcmp.lt.f32.partialorder %v557_v11, 0.0004427343  ;;  %2753 = vmatprep.subr.bf16.mxu1 %v2920_v0 }
  0x92   : > { %2754 = vmatpush3.bf16.msra.mxu1 %v2920_v0 }
  0x93   : > { %v615_v62 = vpack.c.bf16 %v2546_v31, %v2545_v2  ;;  %v550_v30 = vsel %vm549_vm12, %v547_v52, %v544_v35  ;;  %2755 = vmatprep.subr.bf16.mxu1 %v2921_v3 }
  0x94   : > { %v590_v25 = vadd.f32 %v550_v30, %v366_v27 }
  0x95   : > { %2744 = vmatmul.mubr.bf16.gmra.mxu0 %v615_v62 }
  0x96   : > { %v2998_v43 = vpop.eup %2997  ;;  %v2547_v15 = vadd.f32 -0.6931472, %v590_v25  ;;  %2756 = vmatpush3.bf16.msra.mxu1 %v2921_v3 }
  0x97   : > { %v553_v49 = vmul.f32 0.6931472, %v2998_v43  ;;  %2757 = vmatprep.subr.bf16.mxu1 %v2922_v7 }
  0x99   : > { %v3000_v16 = vpop.eup %2999  ;;  %v559_v29 = vsel %vm558_vm13, %v556_v37, %v553_v49 }
  0x9a   : > { %v3002_v46 = vpop.eup %3001  ;;  %v591_v36 = vadd.f32 %v559_v29, %v367_v40  ;;  %v560_v1 = vadd.f32 1.0, %v3000_v16  ;;  %v563_v8 = vmul.f32 -0.5, %v3000_v16  ;;  %v566_v4 = vand.u32 2147483647, %v3000_v16  ;;  %2758 = vmatpush3.bf16.msra.mxu1 %v2922_v7 }
  0x9b   : > { %v569_v10 = vadd.f32 1.0, %v3002_v46  ;;  %v572_v19 = vmul.f32 -0.5, %v3002_v46  ;;  %v575_v51 = vand.u32 2147483647, %v3002_v46  ;;  %2759 = vmatprep.subr.bf16.mxu1 %v2923_v6 }
  0x9c   : > { %v2548_v13 = vadd.f32 -0.6931472, %v591_v36  ;;  %3003 = vlog2.f32 %v560_v1  ;;  %v564_v53 = vadd.f32 1.0, %v563_v8  ;;  %vm567_vm14 = vcmp.lt.f32.partialorder %v566_v4, 0.0004427343 }
  0x9d   : > { %3005 = vlog2.f32 %v569_v10  ;;  %v573_v50 = vadd.f32 1.0, %v572_v19  ;;  %vm576_vm15 = vcmp.lt.f32.partialorder %v575_v51, 0.0004427343 }
  0x9e   : > { %v616_v47 = vpack.c.bf16 %v2548_v13, %v2547_v15  ;;  %v565_v14 = vmul.f32 %v3000_v16, %v564_v53  ;;  %2760 = vmatpush3.bf16.msra.mxu1 %v2923_v6 }
  0x9f   : > { %v574_v21 = vmul.f32 %v3002_v46, %v573_v50  ;;  %2761 = vmatprep.subr.bf16.mxu1 %v2924_v60 }
  0xa0   : > { %2747 = vmatprep.mubr.bf16.mxu0 %v616_v47 }
  0xa2   : > { %2762 = vmatpush3.bf16.msra.mxu1 %v2924_v60 }
  0xa3   : > { %2763 = vmatprep.subr.bf16.mxu1 %v2925_v12 }
  0xa6   : > { %2764 = vmatpush3.bf16.msra.mxu1 %v2925_v12 }
  0xa7   : > { %2765 = vmatprep.subr.bf16.mxu1 %v2926_v22 }
  0xa9   : > { %v3004_v57 = vpop.eup %3003 }
  0xaa   : > { %v3006_v42 = vpop.eup %3005  ;;  %v562_v5 = vmul.f32 0.6931472, %v3004_v57  ;;  %2766 = vmatpush3.bf16.msra.mxu1 %v2926_v22 }
  0xab   : > { %v571_v54 = vmul.f32 0.6931472, %v3006_v42 }
  0xac   : > { %v568_v41 = vsel %vm567_vm14, %v565_v14, %v562_v5 }
  0xad   : > { %v577_v20 = vsel %vm576_vm15, %v574_v21, %v571_v54  ;;  %v592_v55 = vadd.f32 %v568_v41, %v368_v58 }
  0xae   : > { %v593_v26 = vadd.f32 %v577_v20, %v369_v48 }
  0xaf   : > { %v2549_v33 = vadd.f32 -0.6931472, %v592_v55 }
  0xb0   : > { %v2550_v32 = vadd.f32 -0.6931472, %v593_v26 }
  0xb2   : > { %v617_v23 = vpack.c.bf16 %v2550_v32, %v2549_v33 }
  0xb4   : > { %2748 = vmatmul.mubr.bf16.gmra.mxu0 %v617_v23 }
 0x144   : > { %v2737_v17 = vpop.f32.mrf.mxu0 }
 0x145   : > { %v3795_v56 = vadd.f32 %v2737_v17, %v3792_v24 }
 0x146   : > { %v704_v34 = vpop.f32.mrf.mxu0 }
 0x147   : > { %v785_v28 = vand.u32 2147483647, %v3795_v56  ;;  %v3802_v44 = vadd.f32 %v3792_v24, %v704_v34 }
 0x148   : > { %v2738_v9 = vpop.f32.mrf.mxu0 }
 0x149   : > { %v801_v61 = vsub.f32 0.0, %v785_v28  ;;  %v3799_v18 = vadd.f32 %v2738_v9, %v3792_v24  ;;  %v783_v31 = vand.u32 2147483647, %v3802_v44 }
 0x14a   : > { %v707_v38 = vpop.f32.mrf.mxu0 }
 0x14b   : > { %v819_v63 = vmul.f32 1.442695, %v801_v61  ;;  %v786_v2 = vand.u32 2147483647, %v3799_v18  ;;  %v3806_v27 = vadd.f32 %v3792_v24, %v707_v38  ;;  %v799_v49 = vsub.f32 0.0, %v783_v31 }
 0x14d   : > { %v2741_v52 = vpop.f32.mrf.mxu0  ;;  %3007 = vpow2.f32 %v819_v63  ;;  %v802_v45 = vsub.f32 0.0, %v786_v2  ;;  %v784_v43 = vand.u32 2147483647, %v3806_v27  ;;  %v815_v47 = vmul.f32 1.442695, %v799_v49 }
 0x14e   : > { %v3809_v39 = vadd.f32 %v2741_v52, %v3792_v24  ;;  %v769_v2 = vmax.f32 %v3795_v56, 0.0  ;;  %v767_v52 = vmax.f32 %v3802_v44, 0.0 }
 0x14f   : > { %v720_v35 = vpop.f32.mrf.mxu0  ;;  %v821_v11 = vmul.f32 1.442695, %v802_v45  ;;  %v800_v1 = vsub.f32 0.0, %v784_v43 }
 0x150   : > { %v789_v62 = vand.u32 2147483647, %v3809_v39  ;;  %v3814_v30 = vadd.f32 %v3792_v24, %v720_v35  ;;  %v773_v49 = vmax.f32 %v3809_v39, 0.0 }
 0x151   : > { %v2742_v37 = vpop.f32.mrf.mxu0  ;;  %3009 = vpow2.f32 %v821_v11  ;;  %v817_v14 = vmul.f32 1.442695, %v800_v1  ;;  %v770_v11 = vmax.f32 %v3799_v18, 0.0 }
 0x152   : > { %v805_v40 = vsub.f32 0.0, %v789_v62  ;;  %v3818_v25 = vadd.f32 %v2742_v37, %v3792_v24  ;;  %v787_v16 = vand.u32 2147483647, %v3814_v30  ;;  %v768_v62 = vmax.f32 %v3806_v27, 0.0 }
 0x153   : > { %v723_v29 = vpop.f32.mrf.mxu0 }
 0x154   : > { %v790_v46 = vand.u32 2147483647, %v3818_v25  ;;  %v3823_v36 = vadd.f32 %v3792_v24, %v723_v29  ;;  %v803_v15 = vsub.f32 0.0, %v787_v16  ;;  %v827_v10 = vmul.f32 1.442695, %v805_v40 }
 0x155   : > { %v2745_v53 = vpop.f32.mrf.mxu0  ;;  %v771_v16 = vmax.f32 %v3814_v30, 0.0 }
 0x156   : > { %v788_v13 = vand.u32 2147483647, %v3823_v36  ;;  %v823_v8 = vmul.f32 1.442695, %v803_v15  ;;  %v806_v19 = vsub.f32 0.0, %v790_v46  ;;  %v3827_v50 = vadd.f32 %v2745_v53, %v3792_v24 }
 0x157   : > { %v736_v51 = vpop.f32.mrf.mxu0  ;;  %v774_v15 = vmax.f32 %v3818_v25, 0.0 }
 0x158   : > { %v804_v4 = vsub.f32 0.0, %v788_v13  ;;  %3011 = vpow2.f32 %v823_v8  ;;  %v829_v21 = vmul.f32 1.442695, %v806_v19  ;;  %v3832_v42 = vadd.f32 %v3792_v24, %v736_v51 }
 0x159   : > { %3013 = vpow2.f32 %v827_v10  ;;  %v2746_v48 = vpop.f32.mrf.mxu0  ;;  %v793_v54 = vand.u32 2147483647, %v3827_v50 }
 0x15a   : > { %v825_v57 = vmul.f32 1.442695, %v804_v4  ;;  %v3829_v58 = vpop.eup %3007  ;;  %3015 = vpow2.f32 %v815_v47  ;;  %v791_v41 = vand.u32 2147483647, %v3832_v42  ;;  %v3838_v20 = vadd.f32 %v2746_v48, %v3792_v24 }
 0x15b   : > { %v865_v5 = vadd.f32 1.0, %v3829_v58  ;;  %v739_v55 = vpop.f32.mrf.mxu0  ;;  %v809_v59 = vsub.f32 0.0, %v793_v54  ;;  %v868_v38 = vmul.f32 -0.5, %v3829_v58  ;;  %v871_v46 = vand.u32 2147483647, %v3829_v58 }
 0x15c   : > { %3017 = vpow2.f32 %v825_v57  ;;  %v3841_v26 = vadd.f32 %v3792_v24, %v739_v55  ;;  %v807_v33 = vsub.f32 0.0, %v791_v41  ;;  %v794_v32 = vand.u32 2147483647, %v3838_v20 }
 0x15d   : > { %3019 = vpow2.f32 %v817_v14  ;;  %v835_v12 = vmul.f32 1.442695, %v809_v59  ;;  %v869_v29 = vadd.f32 1.0, %v868_v38  ;;  %v772_v57 = vmax.f32 %v3823_v36, 0.0 }
 0x15e   : > { %3021 = vpow2.f32 %v829_v21  ;;  %v3844_v23 = vpop.eup %3009  ;;  %v831_v0 = vmul.f32 1.442695, %v807_v33  ;;  %v810_v3 = vsub.f32 0.0, %v794_v32  ;;  %v792_v7 = vand.u32 2147483647, %v3841_v26 }
 0x15f   : > { %3023 = vlog2.f32 %v865_v5  ;;  %v874_v6 = vadd.f32 1.0, %v3844_v23  ;;  %v877_v40 = vmul.f32 -0.5, %v3844_v23  ;;  %v880_v10 = vand.u32 2147483647, %v3844_v23 }
 0x160   : > { %3025 = vpow2.f32 %v831_v0  ;;  %v837_v60 = vmul.f32 1.442695, %v810_v3  ;;  %v808_v22 = vsub.f32 0.0, %v792_v7  ;;  %v775_v21 = vmax.f32 %v3832_v42, 0.0 }
 0x161   : > { %3027 = vlog2.f32 %v874_v6  ;;  %v878_v51 = vadd.f32 1.0, %v877_v40  ;;  %v870_v5 = vmul.f32 %v3829_v58, %v869_v29  ;;  %vm3886_vm0 = vcmp.lt.f32.partialorder %v871_v46, 0.0004427343 }
 0x162   : > { %v833_v28 = vmul.f32 1.442695, %v808_v22  ;;  %3029 = vpow2.f32 %v837_v60  ;;  %v776_v32 = vmax.f32 %v3841_v26, 0.0  ;;  %vm3893_vm1 = vcmp.lt.f32.partialorder %v880_v10, 0.0004427343 }
 0x163   : > { %3031 = vpow2.f32 %v835_v12  ;;  %v879_v7 = vmul.f32 %v3844_v23, %v878_v51 }
 0x164   : > { %3033 = vpow2.f32 %v833_v28 }
 0x165   : > { %v3848_v17 = vpop.eup %3011 }
 0x166   : > { %v3850_v34 = vpop.eup %3013  ;;  %v883_v63 = vadd.f32 1.0, %v3848_v17  ;;  %v886_v8 = vmul.f32 -0.5, %v3848_v17  ;;  %v889_v60 = vand.u32 2147483647, %v3848_v17 }
 0x167   : > { %v3852_v9 = vpop.eup %3015  ;;  %v901_v45 = vadd.f32 1.0, %v3850_v34  ;;  %v904_v13 = vmul.f32 -0.5, %v3850_v34  ;;  %v907_v6 = vand.u32 2147483647, %v3850_v34 }
 0x168   : > { %v847_v37 = vadd.f32 1.0, %v3852_v9  ;;  %v850_v53 = vmul.f32 -0.5, %v3852_v9  ;;  %v887_v0 = vadd.f32 1.0, %v886_v8  ;;  %vm3926_vm2 = vcmp.lt.f32.partialorder %v889_v60, 0.0004427343 }
 0x169   : > { %v3854_v61 = vpop.eup %3017  ;;  %v905_v55 = vadd.f32 1.0, %v904_v13  ;;  %vm3976_vm6 = vcmp.lt.f32.partialorder %v907_v6, 0.0004427343 }
 0x16a   : > { %v892_v31 = vadd.f32 1.0, %v3854_v61  ;;  %v3862_v35 = vpop.eup %3019  ;;  %v895_v33 = vmul.f32 -0.5, %v3854_v61  ;;  %v851_v3 = vadd.f32 1.0, %v850_v53  ;;  %v898_v38 = vand.u32 2147483647, %v3854_v61 }
 0x16b   : > { %v3867_v43 = vpop.eup %3021  ;;  %v856_v47 = vadd.f32 1.0, %v3862_v35  ;;  %v3909_v23 = vmul.f32 %v3850_v34, %v905_v55  ;;  %v859_v29 = vmul.f32 -0.5, %v3862_v35 }
 0x16c   : > { %3035 = vlog2.f32 %v892_v31  ;;  %v3024_v1 = vpop.eup %3023  ;;  %v910_v19 = vadd.f32 1.0, %v3867_v43  ;;  %v913_v14 = vmul.f32 -0.5, %v3867_v43  ;;  %v916_v10 = vand.u32 2147483647, %v3867_v43 }
 0x16d   : > { %3037 = vlog2.f32 %v883_v63  ;;  %v3880_v4 = vpop.eup %3025  ;;  %v867_v48 = vmul.f32 0.6931472, %v3024_v1  ;;  %v3916_v1 = vmul.f32 %v3848_v17, %v887_v0  ;;  %vm3935_vm3 = vcmp.lt.f32.partialorder %v898_v38, 0.0004427343 }
 0x16e   : > { %3039 = vlog2.f32 %v901_v45  ;;  %v919_v41 = vadd.f32 1.0, %v3880_v4  ;;  %v3028_v58 = vpop.eup %3027  ;;  %v914_v12 = vadd.f32 1.0, %v913_v14  ;;  %v853_v45 = vand.u32 2147483647, %v3852_v9 }
 0x16f   : > { %3041 = vlog2.f32 %v847_v37  ;;  %v3900_v22 = vpop.eup %3029  ;;  %v873_v28 = vsel %vm3886_vm0, %v870_v5, %v867_v48  ;;  %v896_v37 = vadd.f32 1.0, %v895_v33  ;;  %v876_v46 = vmul.f32 0.6931472, %v3028_v58 }
 0x170   : > { %3043 = vlog2.f32 %v856_v47  ;;  %v3906_v31 = vpop.eup %3031  ;;  %v3920_v47 = vmul.f32 %v3852_v9, %v851_v3  ;;  %v993_v34 = vadd.f32 %v873_v28, %v769_v2  ;;  %v3931_v53 = vmul.f32 %v3867_v43, %v914_v12 }
 0x171   : > { %3045 = vlog2.f32 %v910_v19  ;;  %v3922_v8 = vpop.eup %3033  ;;  %v946_v17 = vadd.f32 1.0, %v3900_v22  ;;  %v937_v48 = vadd.f32 1.0, %v3906_v31  ;;  %vm3941_vm4 = vcmp.lt.f32.partialorder %v853_v45, 0.0004427343 }
 0x172   : > { %3047 = vlog2.f32 %v919_v41  ;;  %v928_v56 = vadd.f32 1.0, %v3922_v8  ;;  %v897_v54 = vmul.f32 %v3854_v61, %v896_v37  ;;  %v3947_v41 = vmul.f32 -0.5, %v3906_v31 }
 0x173   : > { %v860_v55 = vadd.f32 1.0, %v859_v29  ;;  %v862_v33 = vand.u32 2147483647, %v3862_v35  ;;  %v882_v3 = vsel %vm3893_vm1, %v879_v7, %v876_v46  ;;  %v3952_v38 = vadd.f32 -0.6931472, %v993_v34 }
 0x174   : > { %v2749_v63 = vpop.f32.mrf.mxu0  ;;  %3049 = vlog2.f32 %v928_v56  ;;  %v925_v37 = vand.u32 2147483647, %v3880_v4  ;;  %v994_v59 = vadd.f32 %v882_v3, %v770_v11  ;;  %vm3970_vm5 = vcmp.lt.f32.partialorder %v916_v10, 0.0004427343 }
 0x175   : > { %v3912_v40 = vadd.f32 %v2749_v63, %v3792_v24  ;;  %v922_v63 = vmul.f32 -0.5, %v3880_v4  ;;  %3051 = vlog2.f32 %v946_v17  ;;  %v931_v9 = vmul.f32 -0.5, %v3922_v8 }
 0x176   : > { %v752_v13 = vpop.f32.mrf.mxu0  ;;  %3053 = vlog2.f32 %v937_v48  ;;  %v861_v19 = vmul.f32 %v3862_v35, %v860_v55  ;;  %vm863_vm7 = vcmp.lt.f32.partialorder %v862_v33, 0.0004427343  ;;  %v2563_v55 = vadd.f32 -0.6931472, %v994_v59 }
 0x177   : > { %v797_v51 = vand.u32 2147483647, %v3912_v40  ;;  %v3956_v61 = vadd.f32 %v3792_v24, %v752_v13  ;;  %v923_v56 = vadd.f32 1.0, %v922_v63  ;;  %vm4001_vm8 = vcmp.lt.f32.partialorder %v925_v37, 0.0004427343 }
 0x178   : > { %v2750_v2 = vpop.f32.mrf.mxu0  ;;  %v1024_v48 = vpack.c.bf16 %v2563_v55, %v3952_v38 }
 0x179   : > { %v3036_v14 = vpop.eup %3035  ;;  %v813_v60 = vsub.f32 0.0, %v797_v51  ;;  %v795_v7 = vand.u32 2147483647, %v3956_v61  ;;  %v3963_v46 = vadd.f32 %v2750_v2, %v3792_v24  ;;  %v924_v30 = vmul.f32 %v3880_v4, %v923_v56 }
 0x17a   : > { %v3038_v43 = vpop.eup %3037  ;;  %v894_v58 = vmul.f32 0.6931472, %v3036_v14  ;;  %v755_v12 = vpop.f32.mrf.mxu0 }
 0x17b   : > { %v3040_v0 = vpop.eup %3039  ;;  %v885_v45 = vmul.f32 0.6931472, %v3038_v43  ;;  %v843_v29 = vmul.f32 1.442695, %v813_v60  ;;  %v3966_v34 = vadd.f32 %v3792_v24, %v755_v12  ;;  %v949_v24 = vmul.f32 -0.5, %v3900_v22 }
 0x17c   : > { %v3042_v28 = vpop.eup %3041  ;;  %v3968_v51 = vmul.f32 0.6931472, %v3040_v0  ;;  %v900_v14 = vsel %vm3935_vm3, %v897_v54, %v894_v58  ;;  %v811_v2 = vsub.f32 0.0, %v795_v7  ;;  %v798_v43 = vand.u32 2147483647, %v3963_v46 }
 0x17d   : > { %v3044_v17 = vpop.eup %3043  ;;  %3055 = vpow2.f32 %v843_v29  ;;  %v849_v18 = vmul.f32 0.6931472, %v3042_v28  ;;  %v891_v10 = vsel %vm3926_vm2, %v3916_v1, %v885_v45  ;;  %v796_v54 = vand.u32 2147483647, %v3966_v34 }
 0x17e   : > { %v3046_v11 = vpop.eup %3045  ;;  %v996_v3 = vadd.f32 %v900_v14, %v772_v57  ;;  %v839_v58 = vmul.f32 1.442695, %v811_v2  ;;  %v814_v60 = vsub.f32 0.0, %v798_v43  ;;  %v858_v12 = vmul.f32 0.6931472, %v3044_v17 }
 0x17f   : > { %v855_v6 = vsel %vm3941_vm4, %v3920_v47, %v849_v18  ;;  %v3048_v0 = vpop.eup %3047  ;;  %v912_v28 = vmul.f32 0.6931472, %v3046_v11  ;;  %v812_v63 = vsub.f32 0.0, %v796_v54  ;;  %v995_v1 = vadd.f32 %v891_v10, %v771_v16 }
 0x180   : > { %3057 = vpow2.f32 %v839_v58  ;;  %v845_v45 = vmul.f32 1.442695, %v814_v60  ;;  %v991_v47 = vadd.f32 %v855_v6, %v767_v52  ;;  %v921_v5 = vmul.f32 0.6931472, %v3048_v0 }
 0x181   : > { %v932_v29 = vadd.f32 1.0, %v931_v9  ;;  %v841_v36 = vmul.f32 1.442695, %v812_v63  ;;  %v864_v57 = vsel %vm863_vm7, %v861_v19, %v858_v12  ;;  %v2565_v7 = vadd.f32 -0.6931472, %v996_v3  ;;  %v3050_v44 = vpop.eup %3049 }
 0x182   : > { %v934_v17 = vand.u32 2147483647, %v3922_v8  ;;  %3059 = vpow2.f32 %v845_v45  ;;  %v992_v35 = vadd.f32 %v864_v57, %v768_v62  ;;  %v2564_v52 = vadd.f32 -0.6931472, %v995_v1  ;;  %v3052_v11 = vpop.eup %3051 }
 0x183   : > { %3061 = vpow2.f32 %v841_v36  ;;  %v918_v33 = vsel %vm3970_vm5, %v3931_v53, %v912_v28  ;;  %v2560_v14 = vadd.f32 -0.6931472, %v991_v47  ;;  %v909_v27 = vsel %vm3976_vm6, %v3909_v23, %v3968_v51  ;;  %v3054_v59 = vpop.eup %3053 }
 0x184   : > { %v2561_v18 = vadd.f32 -0.6931472, %v992_v35  ;;  %v927_v62 = vsel %vm4001_vm8, %v924_v30, %v921_v5  ;;  %v930_v4 = vmul.f32 0.6931472, %v3050_v44  ;;  %v933_v37 = vmul.f32 %v3922_v8, %v932_v29 }
 0x185   : > { %v950_v56 = vadd.f32 1.0, %v949_v24  ;;  %vm935_vm9 = vcmp.lt.f32.partialorder %v934_v17, 0.0004427343  ;;  %v1025_v13 = vpack.c.bf16 %v2565_v7, %v2564_v52  ;;  %v998_v53 = vadd.f32 %v918_v33, %v774_v15 }
 0x186   : > { %v1023_v2 = vpack.c.bf16 %v2561_v18, %v2560_v14  ;;  %v952_v43 = vand.u32 2147483647, %v3900_v22  ;;  %v936_v10 = vsel %vm935_vm9, %v933_v37, %v930_v4  ;;  %v941_v51 = vadd.f32 1.0, %v3947_v41 }
 0x187   : > { %v999_v8 = vadd.f32 %v927_v62, %v775_v21  ;;  %v948_v9 = vmul.f32 0.6931472, %v3052_v11  ;;  %v1000_v24 = vadd.f32 %v936_v10, %v776_v32  ;;  %v997_v25 = vadd.f32 %v909_v27, %v773_v49 }
 0x188   : > { %2767 = vmatprep.mubr.bf16.mxu1 %v1023_v2  ;;  %v943_v15 = vand.u32 2147483647, %v3906_v31  ;;  %v939_v38 = vmul.f32 0.6931472, %v3054_v59  ;;  %v951_v6 = vmul.f32 %v3900_v22, %v950_v56  ;;  %v2567_v42 = vadd.f32 -0.6931472, %v998_v53 }
 0x189   : > { %2768 = vmatmul.mubr.bf16.vlgmr.msra.gmra.mxu1 %v1024_v48  ;;  %v2569_v41 = vadd.f32 -0.6931472, %v1000_v24  ;;  %vm953_vm10 = vcmp.lt.f32.partialorder %v952_v43, 0.0004427343  ;;  %v942_v21 = vmul.f32 %v3906_v31, %v941_v51  ;;  %v2568_v26 = vadd.f32 -0.6931472, %v999_v8 }
 0x18a   : > { %v4019_v23 = vpop.eup %3055  ;;  %2771 = vmatprep.mubr.bf16.mxu1 %v1025_v13  ;;  %v954_v32 = vsel %vm953_vm10, %v951_v6, %v948_v9  ;;  %v2566_v39 = vadd.f32 -0.6931472, %v997_v25  ;;  %vm944_vm11 = vcmp.lt.f32.partialorder %v943_v15, 0.0004427343  ;;  %v778_v49 = vmax.f32 %v3838_v20, 0.0 }
 0x18b   : > { %v973_v54 = vadd.f32 1.0, %v4019_v23  ;;  %v945_v3 = vsel %vm944_vm11, %v942_v21, %v939_v38  ;;  %v1027_v60 = vpack.c.bf16 %v2569_v41, %v2568_v26  ;;  %v777_v22 = vmax.f32 %v3827_v50, 0.0  ;;  %v2928_v26 = vld [vmem:[#allocation4 + $0x70] sm:$0xff]  }
 0x18c   : > { %v1002_v28 = vadd.f32 %v954_v32, %v778_v49  ;;  %v1026_v63 = vpack.c.bf16 %v2567_v42, %v2566_v39  ;;  %v976_v20 = vmul.f32 -0.5, %v4019_v23  ;;  %v979_v55 = vand.u32 2147483647, %v4019_v23  ;;  %v2930_v32 = vld [vmem:[#allocation4 + $0x60] sm:$0xff]   ;;  %v2932_v39 = vld [vmem:[#allocation4 + $0x50] sm:$0xff]   ;;  %v2933_v49 = vld [vmem:[#allocation4 + $0x48] sm:$0xff]  }
 0x18d   : > { %3063 = vlog2.f32 %v973_v54  ;;  %v3058_v0 = vpop.eup %3057  ;;  %v1001_v31 = vadd.f32 %v945_v3, %v777_v22  ;;  %v781_v37 = vmax.f32 %v3912_v40, 0.0  ;;  %v779_v56 = vmax.f32 %v3956_v61, 0.0  ;;  %v2934_v3 = vld [vmem:[#allocation4 + $0x40] sm:$0xff]  }
 0x18e   : > { %v955_v58 = vadd.f32 1.0, %v3058_v0  ;;  %v2571_v47 = vadd.f32 -0.6931472, %v1002_v28  ;;  %v958_v29 = vmul.f32 -0.5, %v3058_v0  ;;  %v977_v17 = vadd.f32 1.0, %v976_v20 }
 0x18f   : > { %v3060_v12 = vpop.eup %3059  ;;  %v2570_v5 = vadd.f32 -0.6931472, %v1001_v31  ;;  %v961_v30 = vand.u32 2147483647, %v3058_v0  ;;  %vm4038_vm12 = vcmp.lt.f32.partialorder %v979_v55, 0.0004427343 }
 0x190   : > { %v3062_v19 = vpop.eup %3061  ;;  %3065 = vlog2.f32 %v955_v58  ;;  %v982_v1 = vadd.f32 1.0, %v3060_v12  ;;  %v985_v57 = vmul.f32 -0.5, %v3060_v12  ;;  %v959_v35 = vadd.f32 1.0, %v958_v29  ;;  %v4050_v58 = vld [vmem:[%s4823_s4] ss:$0 sm:$0xff] }
 0x191   : > { %v964_v45 = vadd.f32 1.0, %v3062_v19  ;;  %2772 = vmatmul.mubr.bf16.gmra.mxu1 %v1026_v63  ;;  %v1028_v36 = vpack.c.bf16 %v2571_v47, %v2570_v5  ;;  %v967_v50 = vmul.f32 -0.5, %v3062_v19  ;;  %v988_v33 = vand.u32 2147483647, %v3060_v12  ;;  %v3265_v5 = vld [vmem:[%s3555_s20 + $0x18] sm:$0xff] }
 0x192   : > { %3067 = vlog2.f32 %v982_v1  ;;  %2775 = vmatprep.mubr.bf16.mxu1 %v1027_v60  ;;  %v986_v44 = vadd.f32 1.0, %v985_v57  ;;  %v978_v18 = vmul.f32 %v4019_v23, %v977_v17  ;;  %v960_v27 = vmul.f32 %v3058_v0, %v959_v35  ;;  %v2931_v0 = vld [vmem:[#allocation4 + $0x58] sm:$0xff]  }
 0x193   : > { %3069 = vlog2.f32 %v964_v45  ;;  %v968_v14 = vadd.f32 1.0, %v967_v50  ;;  %v970_v62 = vand.u32 2147483647, %v3062_v19  ;;  %vm962_vm13 = vcmp.lt.f32.partialorder %v961_v30, 0.0004427343  ;;  %v3266_v50 = vld [vmem:[%s3555_s20 + $0x8] sm:$0xff] }
 0x194   : > { %v987_v10 = vmul.f32 %v3060_v12, %v986_v44  ;;  %v782_v48 = vmax.f32 %v3963_v46, 0.0  ;;  %vm989_vm14 = vcmp.lt.f32.partialorder %v988_v33, 0.0004427343  ;;  %v780_v9 = vmax.f32 %v3966_v34, 0.0  ;;  %v2927_v46 = vld [vmem:[#allocation4 + $0x78] sm:$0xff]   ;;  %v2929_v34 = vld [vmem:[#allocation4 + $0x68] sm:$0xff]  }
 0x195   : > { %v969_v51 = vmul.f32 %v3062_v19, %v968_v14  ;;  %vm971_vm15 = vcmp.lt.f32.partialorder %v970_v62, 0.0004427343  ;;  %2783 = vmatprep.subr.bf16.mxu0 %v2927_v46  ;;  %v3263_v12 = vld [vmem:[%s3555_s20 + $0x10] sm:$0xff]  ;;  %v3264_v19 = vld [vmem:[%s3555_s20] sm:$0xff] }
 0x196   : > { %2784 = vmatpush3.bf16.msra.mxu0 %v2927_v46 }
 0x197   : > { %2785 = vmatprep.subr.bf16.mxu0 %v2928_v26 }
 0x199   : > { %2776 = vmatmul.mubr.bf16.gmra.mxu1 %v1028_v36 }
 0x19a   : > { %v3064_v7 = vpop.eup %3063  ;;  %2786 = vmatpush3.bf16.msra.mxu0 %v2928_v26 }
 0x19b   : > { %v975_v16 = vmul.f32 0.6931472, %v3064_v7  ;;  %2787 = vmatprep.subr.bf16.mxu0 %v2929_v34 }
 0x19d   : > { %v3066_v52 = vpop.eup %3065  ;;  %v981_v13 = vsel %vm4038_vm12, %v978_v18, %v975_v16 }
 0x19e   : > { %v957_v11 = vmul.f32 0.6931472, %v3066_v52  ;;  %v1005_v24 = vadd.f32 %v981_v13, %v781_v37  ;;  %2788 = vmatpush3.bf16.msra.mxu0 %v2929_v34  ;;  %v3267_v52 = vld [vmem:[%s3555_s20 + $0x30] sm:$0xff]  ;;  %v3269_v13 = vld [vmem:[%s3555_s20 + $0x38] sm:$0xff] }
 0x19f   : > { %v3068_v4 = vpop.eup %3067  ;;  %2789 = vmatprep.subr.bf16.mxu0 %v2930_v32 }
 0x1a0   : > { %v3070_v2 = vpop.eup %3069  ;;  %v963_v53 = vsel %vm962_vm13, %v960_v27, %v957_v11  ;;  %v984_v43 = vmul.f32 0.6931472, %v3068_v4  ;;  %v2574_v41 = vadd.f32 -0.6931472, %v1005_v24  ;;  %v3268_v27 = vld [vmem:[%s3555_s20 + $0x20] sm:$0xff] }
 0x1a1   : > { %v966_v23 = vmul.f32 0.6931472, %v3070_v2  ;;  %v1003_v40 = vadd.f32 %v963_v53, %v779_v56 }
 0x1a2   : > { %v990_v8 = vsel %vm989_vm14, %v987_v10, %v984_v43  ;;  %2790 = vmatpush3.bf16.msra.mxu0 %v2930_v32 }
 0x1a3   : > { %v1006_v61 = vadd.f32 %v990_v8, %v782_v48  ;;  %v972_v25 = vsel %vm971_vm15, %v969_v51, %v966_v23  ;;  %v2572_v38 = vadd.f32 -0.6931472, %v1003_v40  ;;  %2791 = vmatprep.subr.bf16.mxu0 %v2931_v0  ;;  %v3270_v40 = vld [vmem:[%s3555_s20 + $0x28] sm:$0xff] }
 0x1a4   : > { %v1004_v15 = vadd.f32 %v972_v25, %v780_v9  ;;  %v3271_v25 = vld [vmem:[%s3555_s20 + $0x50] sm:$0xff] }
 0x1a5   : > { %v2575_v54 = vadd.f32 -0.6931472, %v1006_v61 }
 0x1a6   : > { %v2573_v6 = vadd.f32 -0.6931472, %v1004_v15  ;;  %2792 = vmatpush3.bf16.msra.mxu0 %v2931_v0 }
 0x1a7   : > { %v1030_v21 = vpack.c.bf16 %v2575_v54, %v2574_v41  ;;  %2793 = vmatprep.subr.bf16.mxu0 %v2932_v39 }
 0x1a8   : > { %v1029_v42 = vpack.c.bf16 %v2573_v6, %v2572_v38 }
 0x1aa   : > { %2779 = vmatprep.mubr.bf16.mxu1 %v1029_v42  ;;  %2794 = vmatpush3.bf16.msra.mxu0 %v2932_v39  ;;  %v3272_v42 = vld [vmem:[%s3555_s20 + $0x40] sm:$0xff] }
 0x1ab   : > { %2780 = vmatmul.mubr.bf16.gmra.mxu1 %v1030_v21  ;;  %2795 = vmatprep.subr.bf16.mxu0 %v2933_v49 }
 0x1ae   : > { %2796 = vmatpush3.bf16.msra.mxu0 %v2933_v49  ;;  %v3273_v49 = vld [vmem:[%s3555_s20 + $0x58] sm:$0xff] }
 0x1af   : > { %2797 = vmatprep.subr.bf16.mxu0 %v2934_v3 }
 0x1b2   : > { %2798 = vmatpush3.bf16.msra.mxu0 %v2934_v3 }
 0x249   : > { %v2769_v60 = vpop.f32.mrf.mxu1 }
 0x24a   : > { %v1178_v22 = vadd.f32 %v3263_v12, %v2769_v60 }
 0x24b   : > { %v1113_v28 = vpop.f32.mrf.mxu1 }
 0x24c   : > { %v4054_v63 = vadd.f32 %v4050_v58, %v1178_v22  ;;  %v1176_v1 = vadd.f32 %v3264_v19, %v1113_v28  ;;  %v3274_v22 = vld [vmem:[%s3555_s20 + $0x48] sm:$0xff] }
 0x24d   : > { %v2770_v31 = vpop.f32.mrf.mxu1 }
 0x24e   : > { %v1266_v45 = vand.u32 2147483647, %v4054_v63  ;;  %v4059_v47 = vadd.f32 %v4050_v58, %v1176_v1  ;;  %v1179_v20 = vadd.f32 %v3265_v5, %v2770_v31 }
 0x24f   : > { %v1116_v29 = vpop.f32.mrf.mxu1 }
 0x250   : > { %v1282_v36 = vsub.f32 0.0, %v1266_v45  ;;  %v1264_v57 = vand.u32 2147483647, %v4059_v47  ;;  %v4064_v7 = vadd.f32 %v4050_v58, %v1179_v20  ;;  %v1177_v17 = vadd.f32 %v3266_v50, %v1116_v29 }
 0x251   : > { %v2773_v35 = vpop.f32.mrf.mxu1 }
 0x252   : > { %v1300_v55 = vmul.f32 1.442695, %v1282_v36  ;;  %v1280_v30 = vsub.f32 0.0, %v1264_v57  ;;  %v1267_v16 = vand.u32 2147483647, %v4064_v7  ;;  %v4069_v44 = vadd.f32 %v4050_v58, %v1177_v17 }
 0x253   : > { %v1182_v33 = vadd.f32 %v3267_v52, %v2773_v35  ;;  %v1129_v14 = vpop.f32.mrf.mxu1  ;;  %v1250_v52 = vmax.f32 %v4054_v63, 0.0 }
 0x254   : > { %3071 = vpow2.f32 %v1300_v55  ;;  %v1296_v18 = vmul.f32 1.442695, %v1280_v30  ;;  %v1283_v11 = vsub.f32 0.0, %v1267_v16  ;;  %v1180_v62 = vadd.f32 %v3268_v27, %v1129_v14 }
 0x255   : > { %v1265_v4 = vand.u32 2147483647, %v4069_v44  ;;  %v4075_v37 = vadd.f32 %v4050_v58, %v1182_v33  ;;  %v2774_v59 = vpop.f32.mrf.mxu1  ;;  %v1248_v27 = vmax.f32 %v4059_v47, 0.0 }
 0x256   : > { %3073 = vpow2.f32 %v1296_v18  ;;  %v1302_v56 = vmul.f32 1.442695, %v1283_v11  ;;  %v4078_v2 = vadd.f32 %v4050_v58, %v1180_v62  ;;  %v1183_v53 = vadd.f32 %v3269_v13, %v2774_v59 }
 0x257   : > { %v1281_v43 = vsub.f32 0.0, %v1265_v4  ;;  %v1132_v10 = vpop.f32.mrf.mxu1  ;;  %v1270_v24 = vand.u32 2147483647, %v4075_v37  ;;  %v1251_v62 = vmax.f32 %v4064_v7, 0.0 }
 0x258   : > { %3075 = vpow2.f32 %v1302_v56  ;;  %v1268_v48 = vand.u32 2147483647, %v4078_v2  ;;  %v4083_v51 = vadd.f32 %v4050_v58, %v1183_v53  ;;  %v1181_v8 = vadd.f32 %v3270_v40, %v1132_v10 }
 0x259   : > { %v1298_v23 = vmul.f32 1.442695, %v1281_v43  ;;  %v2777_v9 = vpop.f32.mrf.mxu1  ;;  %v1286_v32 = vsub.f32 0.0, %v1270_v24  ;;  %v1249_v43 = vmax.f32 %v4069_v44, 0.0  ;;  %v3275_v24 = vld [vmem:[%s3555_s20 + $0x70] sm:$0xff] }
 0x25a   : > { %v1284_v61 = vsub.f32 0.0, %v1268_v48  ;;  %v1186_v15 = vadd.f32 %v3271_v25, %v2777_v9  ;;  %v4089_v54 = vadd.f32 %v4050_v58, %v1181_v8  ;;  %v1271_v46 = vand.u32 2147483647, %v4083_v51 }
 0x25b   : > { %3077 = vpow2.f32 %v1298_v23  ;;  %v1145_v38 = vpop.f32.mrf.mxu1  ;;  %v1308_v20 = vmul.f32 1.442695, %v1286_v32  ;;  %v3276_v32 = vld [vmem:[%s3555_s20 + $0x60] sm:$0xff] }
 0x25c   : > { %v1304_v6 = vmul.f32 1.442695, %v1284_v61  ;;  %v4092_v41 = vadd.f32 %v4050_v58, %v1186_v15  ;;  %v1184_v21 = vadd.f32 %v3272_v42, %v1145_v38  ;;  %v1269_v26 = vand.u32 2147483647, %v4089_v54 }
 0x25d   : > { %v2778_v34 = vpop.f32.mrf.mxu1  ;;  %v1287_v1 = vsub.f32 0.0, %v1271_v46 }
 0x25e   : > { %3079 = vpow2.f32 %v1304_v6  ;;  %v1285_v0 = vsub.f32 0.0, %v1269_v26  ;;  %v4098_v39 = vadd.f32 %v4050_v58, %v1184_v21  ;;  %v1187_v3 = vadd.f32 %v3273_v49, %v2778_v34 }
 0x25f   : > { %v1148_v60 = vpop.f32.mrf.mxu1  ;;  %v1274_v12 = vand.u32 2147483647, %v4092_v41  ;;  %v1310_v35 = vmul.f32 1.442695, %v1287_v1 }
 0x260   : > { %v1185_v28 = vadd.f32 %v3274_v22, %v1148_v60  ;;  %v1306_v31 = vmul.f32 1.442695, %v1285_v0  ;;  %v4104_v45 = vadd.f32 %v4050_v58, %v1187_v3  ;;  %v1272_v36 = vand.u32 2147483647, %v4098_v39 }
 0x261   : > { %v3072_v19 = vpop.eup %3071  ;;  %v1290_v57 = vsub.f32 0.0, %v1274_v12 }
 0x262   : > { %v1346_v5 = vadd.f32 1.0, %v3072_v19  ;;  %3081 = vpow2.f32 %v1306_v31  ;;  %v4110_v50 = vadd.f32 %v4050_v58, %v1185_v28  ;;  %v1275_v55 = vand.u32 2147483647, %v4104_v45  ;;  %v3277_v31 = vld [vmem:[%s3555_s20 + $0x78] sm:$0xff] }
 0x263   : > { %v4106_v29 = vpop.eup %3073  ;;  %v1349_v33 = vmul.f32 -0.5, %v3072_v19  ;;  %v1288_v14 = vsub.f32 0.0, %v1272_v36  ;;  %v1316_v4 = vmul.f32 1.442695, %v1290_v57  ;;  %v1352_v53 = vand.u32 2147483647, %v3072_v19 }
 0x264   : > { %3083 = vlog2.f32 %v1346_v5  ;;  %v1328_v16 = vadd.f32 1.0, %v4106_v29  ;;  %v1273_v18 = vand.u32 2147483647, %v4110_v50  ;;  %v1291_v56 = vsub.f32 0.0, %v1275_v55 }
 0x265   : > { %v3076_v17 = vpop.eup %3075  ;;  %3085 = vpow2.f32 %v1308_v20  ;;  %v1350_v23 = vadd.f32 1.0, %v1349_v33  ;;  %v1312_v8 = vmul.f32 1.442695, %v1288_v14  ;;  %v1331_v25 = vmul.f32 -0.5, %v4106_v29 }
 0x266   : > { %v1355_v30 = vadd.f32 1.0, %v3076_v17  ;;  %v1358_v59 = vmul.f32 -0.5, %v3076_v17  ;;  %v1289_v10 = vsub.f32 0.0, %v1273_v18  ;;  %v1361_v40 = vand.u32 2147483647, %v3076_v17 }
 0x267   : > { %v1318_v6 = vmul.f32 1.442695, %v1291_v56  ;;  %v1334_v21 = vand.u32 2147483647, %v4106_v29  ;;  %v1351_v49 = vmul.f32 %v3072_v19, %v1350_v23  ;;  %vm4133_vm0 = vcmp.lt.f32.partialorder %v1352_v53, 0.0004427343 }
 0x268   : > { %v4116_v11 = vpop.eup %3077  ;;  %3087 = vlog2.f32 %v1355_v30  ;;  %v1359_v38 = vadd.f32 1.0, %v1358_v59  ;;  %v1314_v26 = vmul.f32 1.442695, %v1289_v10  ;;  %vm4137_vm1 = vcmp.lt.f32.partialorder %v1361_v40, 0.0004427343 }
 0x269   : > { %3089 = vpow2.f32 %v1310_v35  ;;  %v1337_v13 = vadd.f32 1.0, %v4116_v11  ;;  %v1340_v46 = vmul.f32 -0.5, %v4116_v11  ;;  %v1332_v5 = vadd.f32 1.0, %v1331_v25 }
 0x26a   : > { %3091 = vlog2.f32 %v1328_v16  ;;  %v1360_v36 = vmul.f32 %v3076_v17, %v1359_v38  ;;  %vm4148_vm2 = vcmp.lt.f32.partialorder %v1334_v21, 0.0004427343  ;;  %v1343_v10 = vand.u32 2147483647, %v4116_v11 }
 0x26b   : > { %v4122_v48 = vpop.eup %3079  ;;  %v2781_v9 = vpop.f32.mrf.mxu1  ;;  %3093 = vlog2.f32 %v1337_v13  ;;  %v1341_v33 = vadd.f32 1.0, %v1340_v46  ;;  %v1333_v53 = vmul.f32 %v4106_v29, %v1332_v5 }
 0x26c   : > { %3095 = vpow2.f32 %v1316_v4  ;;  %v1190_v61 = vadd.f32 %v3275_v24, %v2781_v9  ;;  %v1364_v15 = vadd.f32 1.0, %v4122_v48  ;;  %v3278_v4 = vld [vmem:[%s3555_s20 + $0x68] sm:$0xff]  ;;  %v1367_v59 = vmul.f32 -0.5, %v4122_v48 }
 0x26d   : > { %v1161_v42 = vpop.f32.mrf.mxu1  ;;  %v1370_v24 = vand.u32 2147483647, %v4122_v48  ;;  %v1342_v38 = vmul.f32 %v4116_v11, %v1341_v33  ;;  %vm1344_vm3 = vcmp.lt.f32.partialorder %v1343_v10, 0.0004427343 }
 0x26e   : > { %v4130_v34 = vadd.f32 %v4050_v58, %v1190_v61  ;;  %v1188_v0 = vadd.f32 %v3276_v32, %v1161_v42  ;;  %3097 = vlog2.f32 %v1364_v15  ;;  %v1368_v46 = vadd.f32 1.0, %v1367_v59 }
 0x26f   : > { %3099 = vpow2.f32 %v1312_v8  ;;  %v2782_v12 = vpop.f32.mrf.mxu1  ;;  %v4141_v22 = vpop.eup %3081  ;;  %vm4186_vm4 = vcmp.lt.f32.partialorder %v1370_v24, 0.0004427343 }
 0x270   : > { %v1278_v28 = vand.u32 2147483647, %v4130_v34  ;;  %v4145_v1 = vadd.f32 %v4050_v58, %v1188_v0  ;;  %v1191_v19 = vadd.f32 %v3277_v31, %v2782_v12  ;;  %3101 = vpow2.f32 %v1318_v6 }
 0x271   : > { %v3084_v20 = vpop.eup %3083  ;;  %v1164_v57 = vpop.f32.mrf.mxu1  ;;  %v1373_v55 = vadd.f32 1.0, %v4141_v22  ;;  %3103 = vpow2.f32 %v1314_v26  ;;  %v1376_v26 = vmul.f32 -0.5, %v4141_v22 }
 0x272   : > { %v1294_v30 = vsub.f32 0.0, %v1278_v28  ;;  %v1276_v16 = vand.u32 2147483647, %v4145_v1  ;;  %v4154_v14 = vpop.eup %3085  ;;  %v4157_v18 = vadd.f32 %v4050_v58, %v1191_v19  ;;  %v1189_v17 = vadd.f32 %v3278_v4, %v1164_v57 }
 0x273   : > { %3105 = vlog2.f32 %v1373_v55  ;;  %v1348_v56 = vmul.f32 0.6931472, %v3084_v20  ;;  %v1382_v6 = vadd.f32 1.0, %v4154_v14 }
 0x274   : > { %v1292_v13 = vsub.f32 0.0, %v1276_v16  ;;  %v1324_v40 = vmul.f32 1.442695, %v1294_v30  ;;  %v1279_v8 = vand.u32 2147483647, %v4157_v18  ;;  %v4165_v9 = vadd.f32 %v4050_v58, %v1189_v17 }
 0x275   : > { %v3088_v23 = vpop.eup %3087  ;;  %v1354_v58 = vsel %vm4133_vm0, %v1351_v49, %v1348_v56  ;;  %v1369_v16 = vmul.f32 %v4122_v48, %v1368_v46 }
 0x276   : > { %v4168_v61 = vpop.eup %3089  ;;  %v1357_v25 = vmul.f32 0.6931472, %v3088_v23  ;;  %v1320_v15 = vmul.f32 1.442695, %v1292_v13  ;;  %v1295_v42 = vsub.f32 0.0, %v1279_v8  ;;  %v1474_v3 = vadd.f32 %v1354_v58, %v1250_v52 }
 0x277   : > { %v3092_v29 = vpop.eup %3091  ;;  %v1277_v21 = vand.u32 2147483647, %v4165_v9  ;;  %v1377_v52 = vadd.f32 1.0, %v1376_v26  ;;  %v1391_v4 = vadd.f32 1.0, %v4168_v61  ;;  %v1379_v13 = vand.u32 2147483647, %v4141_v22 }
 0x278   : > { %v3094_v32 = vpop.eup %3093  ;;  %v1363_v0 = vsel %vm4137_vm1, %v1360_v36, %v1357_v25  ;;  %3107 = vpow2.f32 %v1320_v15  ;;  %v1330_v12 = vmul.f32 0.6931472, %v3092_v29  ;;  %v1326_v5 = vmul.f32 1.442695, %v1295_v42 }
 0x279   : > { %v4178_v28 = vpop.eup %3095  ;;  %v1475_v11 = vadd.f32 %v1363_v0, %v1251_v62  ;;  %3109 = vpow2.f32 %v1324_v40  ;;  %v1293_v31 = vsub.f32 0.0, %v1277_v21  ;;  %v1339_v19 = vmul.f32 0.6931472, %v3094_v32 }
 0x27a   : > { %v1336_v20 = vsel %vm4148_vm2, %v1333_v53, %v1330_v12  ;;  %3111 = vlog2.f32 %v1382_v6  ;;  %v1252_v23 = vmax.f32 %v4078_v2, 0.0  ;;  %v1385_v8 = vmul.f32 -0.5, %v4154_v14 }
 0x27b   : > { %v3098_v49 = vpop.eup %3097  ;;  %v1322_v60 = vmul.f32 1.442695, %v1293_v31  ;;  %v1345_v36 = vsel %vm1344_vm3, %v1342_v38, %v1339_v19  ;;  %v1472_v55 = vadd.f32 %v1336_v20, %v1248_v27  ;;  %v2588_v33 = vadd.f32 -0.6931472, %v1475_v11 }
 0x27c   : > { %v4190_v62 = vpop.eup %3099  ;;  %v1473_v35 = vadd.f32 %v1345_v36, %v1249_v43  ;;  %v1366_v30 = vmul.f32 0.6931472, %v3098_v49  ;;  %v2587_v27 = vadd.f32 -0.6931472, %v1474_v3  ;;  %v1378_v15 = vmul.f32 %v4141_v22, %v1377_v52 }
 0x27d   : > { %3113 = vpow2.f32 %v1322_v60  ;;  %v4198_v17 = vpop.eup %3101  ;;  %v2585_v59 = vadd.f32 -0.6931472, %v1472_v55  ;;  %v1400_v48 = vadd.f32 1.0, %v4190_v62  ;;  %v1253_v38 = vmax.f32 %v4089_v54, 0.0 }
 0x27e   : > { %3115 = vpow2.f32 %v1326_v5  ;;  %v2586_v56 = vadd.f32 -0.6931472, %v1473_v35  ;;  %v4201_v53 = vpop.eup %3103  ;;  %v1372_v43 = vsel %vm4186_vm4, %v1369_v16, %v1366_v30  ;;  %v1505_v24 = vpack.c.bf16 %v2588_v33, %v2587_v27 }
 0x27f   : > { %3117 = vlog2.f32 %v1391_v4  ;;  %vm1380_vm5 = vcmp.lt.f32.partialorder %v1379_v13, 0.0004427343  ;;  %v1476_v6 = vadd.f32 %v1372_v43, %v1252_v23  ;;  %v1409_v29 = vadd.f32 1.0, %v4201_v53 }
 0x280   : > { %v3106_v10 = vpop.eup %3105  ;;  %v1504_v40 = vpack.c.bf16 %v2586_v56, %v2585_v59  ;;  %3119 = vlog2.f32 %v1400_v48  ;;  %v1254_v42 = vmax.f32 %v4075_v37, 0.0  ;;  %v1394_v46 = vmul.f32 -0.5, %v4168_v61 }
 0x281   : > { %v1375_v25 = vmul.f32 0.6931472, %v3106_v10  ;;  %v1418_v26 = vadd.f32 1.0, %v4178_v28  ;;  %v1255_v32 = vmax.f32 %v4083_v51, 0.0  ;;  %v1258_v22 = vmax.f32 %v4092_v41, 0.0 }
 0x282   : > { %2799 = vmatprep.mubr.bf16.mxu0 %v1504_v40  ;;  %3121 = vlog2.f32 %v1409_v29  ;;  %v1386_v12 = vadd.f32 1.0, %v1385_v8  ;;  %v1388_v11 = vand.u32 2147483647, %v4154_v14  ;;  %v1403_v31 = vmul.f32 -0.5, %v4190_v62 }
 0x283   : > { %2800 = vmatmul.mubr.bf16.vlgmr.msra.gmra.mxu0 %v1505_v24  ;;  %v1381_v21 = vsel %vm1380_vm5, %v1378_v15, %v1375_v25  ;;  %3123 = vlog2.f32 %v1418_v26  ;;  %v1256_v5 = vmax.f32 %v4098_v39, 0.0  ;;  %v2589_v20 = vadd.f32 -0.6931472, %v1476_v6 }
 0x284   : > { %v1477_v58 = vadd.f32 %v1381_v21, %v1253_v38  ;;  %v1427_v3 = vadd.f32 1.0, %v4198_v17  ;;  %v1259_v36 = vmax.f32 %v4104_v45, 0.0  ;;  %v1395_v57 = vadd.f32 1.0, %v1394_v46 }
 0x285   : > { %v4216_v0 = vpop.eup %3107  ;;  %v1397_v55 = vand.u32 2147483647, %v4168_v61  ;;  %v1406_v33 = vand.u32 2147483647, %v4190_v62  ;;  %v1387_v52 = vmul.f32 %v4154_v14, %v1386_v12  ;;  %vm4229_vm6 = vcmp.lt.f32.partialorder %v1388_v11, 0.0004427343 }
 0x286   : > { %v4220_v19 = vpop.eup %3109  ;;  %v2590_v49 = vadd.f32 -0.6931472, %v1477_v58  ;;  %v1436_v35 = vadd.f32 1.0, %v4216_v0  ;;  %3125 = vlog2.f32 %v1427_v3  ;;  %v1404_v59 = vadd.f32 1.0, %v1403_v31 }
 0x287   : > { %v3112_v60 = vpop.eup %3111  ;;  %v1412_v13 = vmul.f32 -0.5, %v4201_v53  ;;  %v1415_v27 = vand.u32 2147483647, %v4201_v53  ;;  %v1421_v43 = vmul.f32 -0.5, %v4178_v28  ;;  %v1454_v48 = vadd.f32 1.0, %v4220_v19 }
 0x288   : > { %v1506_v30 = vpack.c.bf16 %v2590_v49, %v2589_v20  ;;  %v1384_v16 = vmul.f32 0.6931472, %v3112_v60  ;;  %3127 = vlog2.f32 %v1436_v35  ;;  %v1257_v14 = vmax.f32 %v4110_v50, 0.0 }
 0x289   : > { %vm4244_vm7 = vcmp.lt.f32.partialorder %v1397_v55, 0.0004427343  ;;  %v1396_v25 = vmul.f32 %v4168_v61, %v1395_v57  ;;  %vm4250_vm8 = vcmp.lt.f32.partialorder %v1406_v33, 0.0004427343  ;;  %v1430_v38 = vmul.f32 -0.5, %v4198_v17 }
 0x28a   : > { %v4233_v56 = vpop.eup %3113  ;;  %2803 = vmatprep.mubr.bf16.mxu0 %v1506_v30  ;;  %v1390_v23 = vsel %vm4229_vm6, %v1387_v52, %v1384_v16  ;;  %3129 = vlog2.f32 %v1454_v48  ;;  %v1405_v29 = vmul.f32 %v4190_v62, %v1404_v59  ;;  %v1439_v21 = vmul.f32 -0.5, %v4216_v0 }
 0x28b   : > { %v4239_v10 = vpop.eup %3115  ;;  %v1445_v8 = vadd.f32 1.0, %v4233_v56  ;;  %v1478_v26 = vadd.f32 %v1390_v23, %v1254_v42  ;;  %v1413_v58 = vadd.f32 1.0, %v1412_v13  ;;  %vm4257_vm9 = vcmp.lt.f32.partialorder %v1415_v27, 0.0004427343 }
 0x28c   : > { %v3118_v24 = vpop.eup %3117  ;;  %v1422_v61 = vadd.f32 1.0, %v1421_v43  ;;  %v1424_v20 = vand.u32 2147483647, %v4178_v28  ;;  %v1463_v49 = vadd.f32 1.0, %v4239_v10  ;;  %v1431_v3 = vadd.f32 1.0, %v1430_v38 }
 0x28d   : > { %v1393_v6 = vmul.f32 0.6931472, %v3118_v24  ;;  %3131 = vlog2.f32 %v1445_v8  ;;  %v3120_v46 = vpop.eup %3119  ;;  %v1433_v60 = vand.u32 2147483647, %v4198_v17  ;;  %v1457_v42 = vmul.f32 -0.5, %v4220_v19 }
 0x28e   : > { %v1402_v31 = vmul.f32 0.6931472, %v3120_v46  ;;  %v1440_v35 = vadd.f32 1.0, %v1439_v21  ;;  %v1448_v30 = vmul.f32 -0.5, %v4233_v56  ;;  %3133 = vlog2.f32 %v1463_v49 }
 0x28f   : > { %v1399_v11 = vsel %vm4244_vm7, %v1396_v25, %v1393_v6  ;;  %v3122_v57 = vpop.eup %3121  ;;  %v2591_v33 = vadd.f32 -0.6931472, %v1478_v26  ;;  %v1414_v59 = vmul.f32 %v4201_v53, %v1413_v58  ;;  %v1423_v27 = vmul.f32 %v4178_v28, %v1422_v61 }
 0x290   : > { %v1479_v62 = vadd.f32 %v1399_v11, %v1255_v32  ;;  %v1408_v55 = vsel %vm4250_vm8, %v1405_v29, %v1402_v31  ;;  %v3124_v16 = vpop.eup %3123  ;;  %v1411_v4 = vmul.f32 0.6931472, %v3122_v57  ;;  %vm4272_vm10 = vcmp.lt.f32.partialorder %v1424_v20, 0.0004427343 }
 0x291   : > { %v1480_v32 = vadd.f32 %v1408_v55, %v1256_v5  ;;  %v1420_v13 = vmul.f32 0.6931472, %v3124_v16  ;;  %vm4278_vm11 = vcmp.lt.f32.partialorder %v1433_v60, 0.0004427343  ;;  %v1442_v8 = vand.u32 2147483647, %v4216_v0 }
 0x292   : > { %v2592_v52 = vadd.f32 -0.6931472, %v1479_v62  ;;  %v1417_v23 = vsel %vm4257_vm9, %v1414_v59, %v1411_v4  ;;  %v1432_v28 = vmul.f32 %v4198_v17, %v1431_v3  ;;  %v1458_v25 = vadd.f32 1.0, %v1457_v42 }
 0x293   : > { %v3126_v24 = vpop.eup %3125  ;;  %v1481_v53 = vadd.f32 %v1417_v23, %v1257_v14  ;;  %v1426_v5 = vsel %vm4272_vm10, %v1423_v27, %v1420_v13  ;;  %v1441_v6 = vmul.f32 %v4216_v0, %v1440_v35  ;;  %v1449_v29 = vadd.f32 1.0, %v1448_v30 }
 0x294   : > { %v1507_v48 = vpack.c.bf16 %v2592_v52, %v2591_v33  ;;  %v1429_v38 = vmul.f32 0.6931472, %v3126_v24  ;;  %v1466_v21 = vmul.f32 -0.5, %v4239_v10  ;;  %v2593_v46 = vadd.f32 -0.6931472, %v1480_v32 }
 0x295   : > { %v3128_v15 = vpop.eup %3127  ;;  %v2594_v26 = vadd.f32 -0.6931472, %v1481_v53  ;;  %v1482_v58 = vadd.f32 %v1426_v5, %v1258_v22  ;;  %vm4292_vm12 = vcmp.lt.f32.partialorder %v1442_v8, 0.0004427343  ;;  %v1451_v61 = vand.u32 2147483647, %v4233_v56 }
 0x296   : > { %2804 = vmatmul.mubr.bf16.gmra.mxu0 %v1507_v48  ;;  %v1438_v14 = vmul.f32 0.6931472, %v3128_v15  ;;  %v1435_v12 = vsel %vm4278_vm11, %v1432_v28, %v1429_v38  ;;  %v1460_v0 = vand.u32 2147483647, %v4220_v19  ;;  %v1260_v31 = vmax.f32 %v4145_v1, 0.0  ;;  %v2935_v15 = vld [vmem:[#allocation6 + $0x78] sm:$0xff]  }
 0x297   : > { %v3130_v11 = vpop.eup %3129  ;;  %v1508_v20 = vpack.c.bf16 %v2594_v26, %v2593_v46  ;;  %v1483_v49 = vadd.f32 %v1435_v12, %v1259_v36  ;;  %v1261_v3 = vmax.f32 %v4165_v9, 0.0  ;;  %v1459_v42 = vmul.f32 %v4220_v19, %v1458_v25  ;;  %2815 = vmatprep.subr.bf16.mxu1 %v2935_v15  ;;  %v2936_v38 = vld [vmem:[#allocation6 + $0x70] sm:$0xff]   ;;  %v2941_v46 = vld [vmem:[#allocation6 + $0x48] sm:$0xff]   ;;  %v2942_v26 = vld [vmem:[#allocation6 + $0x40] sm:$0xff]  }
 0x298   : > { %v1444_v22 = vsel %vm4292_vm12, %v1441_v6, %v1438_v14  ;;  %v1456_v60 = vmul.f32 0.6931472, %v3130_v11  ;;  %v1467_v57 = vadd.f32 1.0, %v1466_v21  ;;  %v2595_v55 = vadd.f32 -0.6931472, %v1482_v58  ;;  %2816 = vmatpush3.bf16.msra.mxu1 %v2935_v15  ;;  %v2937_v6 = vld [vmem:[#allocation6 + $0x68] sm:$0xff]  }
 0x299   : > { %2807 = vmatprep.mubr.bf16.mxu0 %v1508_v20  ;;  %v2596_v35 = vadd.f32 -0.6931472, %v1483_v49  ;;  %v1450_v16 = vmul.f32 %v4233_v56, %v1449_v29  ;;  %vm1452_vm13 = vcmp.lt.f32.partialorder %v1451_v61, 0.0004427343  ;;  %v1484_v33 = vadd.f32 %v1444_v22, %v1260_v31  ;;  %2817 = vmatprep.subr.bf16.mxu1 %v2936_v38  ;;  %v2939_v29 = vld [vmem:[#allocation6 + $0x58] sm:$0xff]   ;;  %v2940_v21 = vld [vmem:[#allocation6 + $0x50] sm:$0xff]  }
 0x29a   : > { %v3132_v62 = vpop.eup %3131  ;;  %vm1461_vm14 = vcmp.lt.f32.partialorder %v1460_v0, 0.0004427343  ;;  %v1469_v36 = vand.u32 2147483647, %v4239_v10  ;;  %v1262_v13 = vmax.f32 %v4130_v34, 0.0  ;;  %v1263_v19 = vmax.f32 %v4157_v18, 0.0 }
 0x29b   : > { %v1447_v30 = vmul.f32 0.6931472, %v3132_v62  ;;  %v1509_v52 = vpack.c.bf16 %v2596_v35, %v2595_v55  ;;  %v1462_v59 = vsel %vm1461_vm14, %v1459_v42, %v1456_v60  ;;  %v3134_v32 = vpop.eup %3133  ;;  %v1468_v48 = vmul.f32 %v4239_v10, %v1467_v57  ;;  %v2938_v10 = vld [vmem:[#allocation6 + $0x60] sm:$0xff]  }
 0x29c   : > { %v1465_v43 = vmul.f32 0.6931472, %v3134_v32  ;;  %v2597_v23 = vadd.f32 -0.6931472, %v1484_v33  ;;  %vm1470_vm15 = vcmp.lt.f32.partialorder %v1469_v36, 0.0004427343  ;;  %v1486_v40 = vadd.f32 %v1462_v59, %v1262_v13  ;;  %2818 = vmatpush3.bf16.msra.mxu1 %v2936_v38 }
 0x29d   : > { %v1453_v4 = vsel %vm1452_vm13, %v1450_v16, %v1447_v30  ;;  %2819 = vmatprep.subr.bf16.mxu1 %v2937_v6  ;;  %v4313_v58 = vld [vmem:[%s4821_s2 + $0x1] ss:$0 sm:$0xff] }
 0x29e   : > { %v1485_v27 = vadd.f32 %v1453_v4, %v1261_v3  ;;  %2808 = vmatmul.mubr.bf16.gmra.mxu0 %v1509_v52  ;;  %v1471_v8 = vsel %vm1470_vm15, %v1468_v48, %v1465_v43  ;;  %v2599_v5 = vadd.f32 -0.6931472, %v1486_v40 }
 0x29f   : > { %v1487_v53 = vadd.f32 %v1471_v8, %v1263_v19 }
 0x2a0   : > { %v2598_v56 = vadd.f32 -0.6931472, %v1485_v27  ;;  %2820 = vmatpush3.bf16.msra.mxu1 %v2937_v6 }
 0x2a1   : > { %v2600_v28 = vadd.f32 -0.6931472, %v1487_v53  ;;  %2821 = vmatprep.subr.bf16.mxu1 %v2938_v10 }
 0x2a2   : > { %v1510_v24 = vpack.c.bf16 %v2598_v56, %v2597_v23 }
 0x2a3   : > { %v1511_v25 = vpack.c.bf16 %v2600_v28, %v2599_v5 }
 0x2a4   : > { %2811 = vmatprep.mubr.bf16.mxu0 %v1510_v24  ;;  %2822 = vmatpush3.bf16.msra.mxu1 %v2938_v10 }
 0x2a5   : > { %2823 = vmatprep.subr.bf16.mxu1 %v2939_v29 }
 0x2a6   : > { %2812 = vmatmul.mubr.bf16.gmra.mxu0 %v1511_v25 }
 0x2a8   : > { %2824 = vmatpush3.bf16.msra.mxu1 %v2939_v29 }
 0x2a9   : > { %2825 = vmatprep.subr.bf16.mxu1 %v2940_v21 }
 0x2ac   : > { %2826 = vmatpush3.bf16.msra.mxu1 %v2940_v21 }
 0x2ad   : > { %2827 = vmatprep.subr.bf16.mxu1 %v2941_v46 }
 0x2b0   : > { %2828 = vmatpush3.bf16.msra.mxu1 %v2941_v46 }
 0x2b1   : > { %2829 = vmatprep.subr.bf16.mxu1 %v2942_v26 }
 0x2b4   : > { %2830 = vmatpush3.bf16.msra.mxu1 %v2942_v26 }
 0x343   : > { %v2801_v14 = vpop.f32.mrf.mxu0 }
 0x344   : > { %v4316_v12 = vadd.f32 %v2801_v14, %v4313_v58 }
 0x345   : > { %v1598_v17 = vpop.f32.mrf.mxu0 }
 0x346   : > { %v1679_v61 = vand.u32 2147483647, %v4316_v12  ;;  %v4320_v0 = vadd.f32 %v4313_v58, %v1598_v17  ;;  %v1663_v21 = vmax.f32 %v4316_v12, 0.0 }
 0x347   : > { %v2802_v11 = vpop.f32.mrf.mxu0 }
 0x348   : > { %v1695_v31 = vsub.f32 0.0, %v1679_v61  ;;  %v1677_v20 = vand.u32 2147483647, %v4320_v0  ;;  %v4324_v49 = vadd.f32 %v2802_v11, %v4313_v58  ;;  %v1661_v26 = vmax.f32 %v4320_v0, 0.0 }
 0x349   : > { %v1601_v22 = vpop.f32.mrf.mxu0 }
 0x34a   : > { %v1713_v62 = vmul.f32 1.442695, %v1695_v31  ;;  %v1693_v3 = vsub.f32 0.0, %v1677_v20  ;;  %v1680_v60 = vand.u32 2147483647, %v4324_v49  ;;  %v4328_v42 = vadd.f32 %v4313_v58, %v1601_v22 }
 0x34c   : > { %3135 = vpow2.f32 %v1713_v62  ;;  %v1709_v57 = vmul.f32 1.442695, %v1693_v3  ;;  %v1696_v55 = vsub.f32 0.0, %v1680_v60  ;;  %v1678_v35 = vand.u32 2147483647, %v4328_v42 }
 0x34d   : > { %v1664_v60 = vmax.f32 %v4324_v49, 0.0 }
 0x34e   : > { %3137 = vpow2.f32 %v1709_v57  ;;  %v1715_v30 = vmul.f32 1.442695, %v1696_v55  ;;  %v1694_v16 = vsub.f32 0.0, %v1678_v35 }
 0x350   : > { %3139 = vpow2.f32 %v1715_v30  ;;  %v1711_v33 = vmul.f32 1.442695, %v1694_v16 }
 0x352   : > { %3141 = vpow2.f32 %v1711_v33 }
 0x356   : > { %v2805_v36 = vpop.f32.mrf.mxu0 }
 0x357   : > { %v4332_v52 = vadd.f32 %v2805_v36, %v4313_v58 }
 0x358   : > { %v1614_v4 = vpop.f32.mrf.mxu0 }
 0x359   : > { %v3136_v59 = vpop.eup %3135  ;;  %v1683_v32 = vand.u32 2147483647, %v4332_v52  ;;  %v4336_v13 = vadd.f32 %v4313_v58, %v1614_v4 }
 0x35a   : > { %v1759_v27 = vadd.f32 1.0, %v3136_v59  ;;  %v2806_v19 = vpop.f32.mrf.mxu0  ;;  %v1762_v6 = vmul.f32 -0.5, %v3136_v59  ;;  %v1765_v11 = vand.u32 2147483647, %v3136_v59 }
 0x35b   : > { %v4338_v43 = vpop.eup %3137  ;;  %v1699_v48 = vsub.f32 0.0, %v1683_v32  ;;  %v1681_v23 = vand.u32 2147483647, %v4336_v13  ;;  %v4346_v28 = vadd.f32 %v2806_v19, %v4313_v58 }
 0x35c   : > { %3143 = vlog2.f32 %v1759_v27  ;;  %v1741_v56 = vadd.f32 1.0, %v4338_v43  ;;  %v1617_v40 = vpop.f32.mrf.mxu0  ;;  %v1763_v62 = vadd.f32 1.0, %v1762_v6  ;;  %v1744_v3 = vmul.f32 -0.5, %v4338_v43 }
 0x35d   : > { %v4342_v8 = vpop.eup %3139  ;;  %v1721_v24 = vmul.f32 1.442695, %v1699_v48  ;;  %v1697_v53 = vsub.f32 0.0, %v1681_v23  ;;  %v1684_v46 = vand.u32 2147483647, %v4346_v28  ;;  %v4355_v14 = vadd.f32 %v4313_v58, %v1617_v40 }
 0x35e   : > { %3145 = vlog2.f32 %v1741_v56  ;;  %v1768_v5 = vadd.f32 1.0, %v4342_v8  ;;  %v2809_v25 = vpop.f32.mrf.mxu0  ;;  %v1771_v35 = vmul.f32 -0.5, %v4342_v8  ;;  %vm4377_vm0 = vcmp.lt.f32.partialorder %v1765_v11, 0.0004427343 }
 0x35f   : > { %3147 = vpow2.f32 %v1721_v24  ;;  %v4348_v15 = vpop.eup %3141  ;;  %v1717_v38 = vmul.f32 1.442695, %v1697_v53  ;;  %v4358_v17 = vadd.f32 %v2809_v25, %v4313_v58  ;;  %v1700_v31 = vsub.f32 0.0, %v1684_v46 }
 0x360   : > { %3149 = vlog2.f32 %v1768_v5  ;;  %v1750_v10 = vadd.f32 1.0, %v4348_v15  ;;  %v1630_v29 = vpop.f32.mrf.mxu0  ;;  %v1682_v57 = vand.u32 2147483647, %v4355_v14  ;;  %v1753_v30 = vmul.f32 -0.5, %v4348_v15 }
 0x361   : > { %3151 = vpow2.f32 %v1717_v38  ;;  %v4361_v20 = vadd.f32 %v4313_v58, %v1630_v29  ;;  %v1723_v16 = vmul.f32 1.442695, %v1700_v31  ;;  %v1687_v33 = vand.u32 2147483647, %v4358_v17 }
 0x362   : > { %3153 = vlog2.f32 %v1750_v10  ;;  %v2810_v61 = vpop.f32.mrf.mxu0  ;;  %v1698_v36 = vsub.f32 0.0, %v1682_v57  ;;  %v1747_v19 = vand.u32 2147483647, %v4338_v43  ;;  %v1745_v56 = vadd.f32 1.0, %v1744_v3 }
 0x363   : > { %v4364_v22 = vadd.f32 %v2810_v61, %v4313_v58  ;;  %v1685_v4 = vand.u32 2147483647, %v4361_v20  ;;  %3155 = vpow2.f32 %v1723_v16  ;;  %v1703_v48 = vsub.f32 0.0, %v1687_v33 }
 0x364   : > { %v1633_v55 = vpop.f32.mrf.mxu0  ;;  %v1774_v40 = vand.u32 2147483647, %v4342_v8  ;;  %v1719_v24 = vmul.f32 1.442695, %v1698_v36  ;;  %v1764_v5 = vmul.f32 %v3136_v59, %v1763_v62  ;;  %v1772_v25 = vadd.f32 1.0, %v1771_v35 }
 0x365   : > { %v1688_v32 = vand.u32 2147483647, %v4364_v22  ;;  %v4375_v27 = vadd.f32 %v4313_v58, %v1633_v55  ;;  %v1701_v53 = vsub.f32 0.0, %v1685_v4  ;;  %v1729_v38 = vmul.f32 1.442695, %v1703_v48 }
 0x366   : > { %v2813_v10 = vpop.f32.mrf.mxu0  ;;  %v1754_v46 = vadd.f32 1.0, %v1753_v30  ;;  %3157 = vpow2.f32 %v1719_v24  ;;  %v1746_v33 = vmul.f32 %v4338_v43, %v1745_v56  ;;  %vm4387_vm1 = vcmp.lt.f32.partialorder %v1747_v19, 0.0004427343 }
 0x367   : > { %v1686_v6 = vand.u32 2147483647, %v4375_v27  ;;  %v1725_v61 = vmul.f32 1.442695, %v1701_v53  ;;  %v1704_v11 = vsub.f32 0.0, %v1688_v32  ;;  %3159 = vpow2.f32 %v1729_v38 }
 0x368   : > { %vm4391_vm2 = vcmp.lt.f32.partialorder %v1774_v40, 0.0004427343  ;;  %v1773_v36 = vmul.f32 %v4342_v8, %v1772_v25  ;;  %v1756_v4 = vand.u32 2147483647, %v4348_v15  ;;  %v1646_v32 = vpop.f32.mrf.mxu0  ;;  %v1755_v19 = vmul.f32 %v4348_v15, %v1754_v46 }
 0x369   : > { %v3144_v23 = vpop.eup %3143  ;;  %v1702_v3 = vsub.f32 0.0, %v1686_v6  ;;  %3161 = vpow2.f32 %v1725_v61  ;;  %v4404_v56 = vadd.f32 %v2813_v10, %v4313_v58  ;;  %v1662_v10 = vmax.f32 %v4328_v42, 0.0 }
 0x36a   : > { %v1761_v57 = vmul.f32 0.6931472, %v3144_v23  ;;  %v1731_v23 = vmul.f32 1.442695, %v1704_v11  ;;  %vm1757_vm3 = vcmp.lt.f32.partialorder %v1756_v4, 0.0004427343 }
 0x36b   : > { %v3146_v29 = vpop.eup %3145  ;;  %v1727_v25 = vmul.f32 1.442695, %v1702_v3  ;;  %v1691_v11 = vand.u32 2147483647, %v4404_v56  ;;  %v2814_v3 = vpop.f32.mrf.mxu0 }
 0x36c   : > { %v4384_v31 = vpop.eup %3147  ;;  %v1743_v55 = vmul.f32 0.6931472, %v3146_v29  ;;  %v1767_v24 = vsel %vm4377_vm0, %v1764_v5, %v1761_v57  ;;  %v4412_v29 = vadd.f32 %v4313_v58, %v1646_v32  ;;  %v4432_v4 = vadd.f32 %v2814_v3, %v4313_v58 }
 0x36d   : > { %v3150_v16 = vpop.eup %3149  ;;  %v1795_v35 = vadd.f32 1.0, %v4384_v31  ;;  %v1887_v49 = vadd.f32 %v1767_v24, %v1663_v21  ;;  %v1801_v24 = vand.u32 2147483647, %v4384_v31 }
 0x36e   : > { %v1770_v30 = vmul.f32 0.6931472, %v3150_v16  ;;  %v4398_v48 = vpop.eup %3151  ;;  %v1749_v43 = vsel %vm4387_vm1, %v1746_v33, %v1743_v55  ;;  %v1689_v57 = vand.u32 2147483647, %v4412_v29 }
 0x36f   : > { %v3154_v40 = vpop.eup %3153  ;;  %v1777_v53 = vadd.f32 1.0, %v4398_v48  ;;  %3163 = vlog2.f32 %v1795_v35  ;;  %v1885_v15 = vadd.f32 %v1749_v43, %v1661_v26  ;;  %v2612_v55 = vadd.f32 -0.6931472, %v1887_v49  ;;  %v1649_v49 = vpop.f32.mrf.mxu0 }
 0x370   : > { %v1776_v8 = vsel %vm4391_vm2, %v1773_v36, %v1770_v30  ;;  %v1752_v6 = vmul.f32 0.6931472, %v3154_v40  ;;  %v1705_v12 = vsub.f32 0.0, %v1689_v57  ;;  %v1707_v35 = vsub.f32 0.0, %v1691_v11 }
 0x371   : > { %v1888_v38 = vadd.f32 %v1776_v8, %v1664_v60  ;;  %3165 = vlog2.f32 %v1777_v53  ;;  %v4419_v60 = vpop.eup %3155  ;;  %v2610_v0 = vadd.f32 -0.6931472, %v1885_v15  ;;  %v1798_v30 = vmul.f32 -0.5, %v4384_v31 }
 0x372   : > { %v1758_v5 = vsel %vm1757_vm3, %v1755_v19, %v1752_v6  ;;  %3167 = vpow2.f32 %v1731_v23  ;;  %v1804_v42 = vadd.f32 1.0, %v4419_v60  ;;  %v1667_v43 = vmax.f32 %v4332_v52, 0.0 }
 0x373   : > { %v1886_v46 = vadd.f32 %v1758_v5, %v1662_v10  ;;  %3169 = vpow2.f32 %v1727_v25  ;;  %v2613_v61 = vadd.f32 -0.6931472, %v1888_v38  ;;  %v4424_v16 = vpop.eup %3157  ;;  %v1780_v19 = vmul.f32 -0.5, %v4398_v48 }
 0x374   : > { %3171 = vlog2.f32 %v1804_v42  ;;  %v4426_v33 = vpop.eup %3159  ;;  %v1786_v62 = vadd.f32 1.0, %v4424_v16  ;;  %v1733_v40 = vmul.f32 1.442695, %v1705_v12  ;;  %v1665_v8 = vmax.f32 %v4336_v13, 0.0 }
 0x375   : > { %v2611_v26 = vadd.f32 -0.6931472, %v1886_v46  ;;  %v1918_v59 = vpack.c.bf16 %v2613_v61, %v2612_v55  ;;  %v1831_v36 = vadd.f32 1.0, %v4426_v33  ;;  %v1668_v53 = vmax.f32 %v4346_v28, 0.0 }
 0x376   : > { %v4434_v32 = vpop.eup %3161  ;;  %3173 = vlog2.f32 %v1786_v62  ;;  %v1737_v25 = vmul.f32 1.442695, %v1707_v35  ;;  %v1799_v6 = vadd.f32 1.0, %v1798_v30  ;;  %v1807_v15 = vmul.f32 -0.5, %v4419_v60 }
 0x377   : > { %v1917_v21 = vpack.c.bf16 %v2611_v26, %v2610_v0  ;;  %3175 = vlog2.f32 %v1831_v36  ;;  %v1813_v23 = vadd.f32 1.0, %v4434_v32  ;;  %v1692_v10 = vand.u32 2147483647, %v4432_v4 }
 0x378   : > { %v1666_v46 = vmax.f32 %v4355_v14, 0.0  ;;  %v1671_v61 = vmax.f32 %v4358_v17, 0.0  ;;  %v1669_v11 = vmax.f32 %v4361_v20, 0.0  ;;  %v1672_v13 = vmax.f32 %v4364_v22, 0.0 }
 0x379   : > { %2831 = vmatprep.mubr.bf16.mxu1 %v1917_v21  ;;  %3177 = vlog2.f32 %v1813_v23  ;;  %v1781_v28 = vadd.f32 1.0, %v1780_v19  ;;  %v1783_v0 = vand.u32 2147483647, %v4398_v48  ;;  %v1708_v26 = vsub.f32 0.0, %v1692_v10 }
 0x37a   : > { %2832 = vmatmul.mubr.bf16.vlgmr.msra.gmra.mxu1 %v1918_v59  ;;  %3179 = vpow2.f32 %v1733_v40  ;;  %v1789_v55 = vmul.f32 -0.5, %v4424_v16  ;;  %v4456_v14 = vadd.f32 %v4313_v58, %v1649_v49  ;;  %v1800_v12 = vmul.f32 %v4384_v31, %v1799_v6 }
 0x37b   : > { %3181 = vpow2.f32 %v1737_v25  ;;  %vm4459_vm4 = vcmp.lt.f32.partialorder %v1801_v24, 0.0004427343  ;;  %v1808_v59 = vadd.f32 1.0, %v1807_v15  ;;  %v1810_v30 = vand.u32 2147483647, %v4419_v60 }
 0x37c   : > { %v3164_v38 = vpop.eup %3163  ;;  %v1792_v36 = vand.u32 2147483647, %v4424_v16  ;;  %v1834_v23 = vmul.f32 -0.5, %v4426_v33  ;;  %v1739_v58 = vmul.f32 1.442695, %v1708_v26  ;;  %v1782_v31 = vmul.f32 %v4398_v48, %v1781_v28 }
 0x37d   : > { %v1797_v19 = vmul.f32 0.6931472, %v3164_v38  ;;  %vm4468_vm5 = vcmp.lt.f32.partialorder %v1783_v0, 0.0004427343  ;;  %v1790_v25 = vadd.f32 1.0, %v1789_v55  ;;  %v1809_v10 = vmul.f32 %v4419_v60, %v1808_v59 }
 0x37e   : > { %v3166_v5 = vpop.eup %3165  ;;  %v1690_v6 = vand.u32 2147483647, %v4456_v14  ;;  %v1816_v49 = vmul.f32 -0.5, %v4434_v32  ;;  %vm1811_vm6 = vcmp.lt.f32.partialorder %v1810_v30, 0.0004427343  ;;  %v1835_v60 = vadd.f32 1.0, %v1834_v23 }
 0x37f   : > { %v4448_v57 = vpop.eup %3167  ;;  %v1779_v35 = vmul.f32 0.6931472, %v3166_v5  ;;  %v1837_v5 = vand.u32 2147483647, %v4426_v33  ;;  %v1803_v0 = vsel %vm4459_vm4, %v1800_v12, %v1797_v19  ;;  %vm4480_vm7 = vcmp.lt.f32.partialorder %v1792_v36, 0.0004427343 }
 0x380   : > { %v4451_v42 = vpop.eup %3169  ;;  %v1840_v3 = vadd.f32 1.0, %v4448_v57  ;;  %v1706_v48 = vsub.f32 0.0, %v1690_v6  ;;  %v1891_v12 = vadd.f32 %v1803_v0, %v1667_v43  ;;  %v1846_v43 = vand.u32 2147483647, %v4448_v57 }
 0x381   : > { %v1822_v62 = vadd.f32 1.0, %v4451_v42  ;;  %v3172_v40 = vpop.eup %3171  ;;  %v1785_v38 = vsel %vm4468_vm5, %v1782_v31, %v1779_v35  ;;  %v1843_v35 = vmul.f32 -0.5, %v4448_v57  ;;  %v1825_v31 = vmul.f32 -0.5, %v4451_v42 }
 0x382   : > { %3183 = vlog2.f32 %v1840_v3  ;;  %v1806_v15 = vmul.f32 0.6931472, %v3172_v40  ;;  %v1889_v30 = vadd.f32 %v1785_v38, %v1665_v8  ;;  %v1817_v40 = vadd.f32 1.0, %v1816_v49 }
 0x383   : > { %3185 = vlog2.f32 %v1822_v62  ;;  %v3174_v28 = vpop.eup %3173  ;;  %v1735_v24 = vmul.f32 1.442695, %v1706_v48  ;;  %vm4491_vm8 = vcmp.lt.f32.partialorder %v1837_v5, 0.0004427343  ;;  %v1844_v52 = vadd.f32 1.0, %v1843_v35 }
 0x384   : > { %3187 = vpow2.f32 %v1739_v58  ;;  %v1812_v26 = vsel %vm1811_vm6, %v1809_v10, %v1806_v15  ;;  %v3176_v3 = vpop.eup %3175  ;;  %v1788_v62 = vmul.f32 0.6931472, %v3174_v28  ;;  %v1791_v58 = vmul.f32 %v4424_v16, %v1790_v25 }
 0x385   : > { %v1892_v59 = vadd.f32 %v1812_v26, %v1668_v53  ;;  %v1819_v16 = vand.u32 2147483647, %v4434_v32  ;;  %v1833_v23 = vmul.f32 0.6931472, %v3176_v3  ;;  %3189 = vpow2.f32 %v1735_v24 }
 0x386   : > { %v3178_v21 = vpop.eup %3177  ;;  %v1794_v36 = vsel %vm4480_vm7, %v1791_v58, %v1788_v62  ;;  %v1836_v15 = vmul.f32 %v4426_v33, %v1835_v60  ;;  %v2614_v49 = vadd.f32 -0.6931472, %v1889_v30  ;;  %v1818_v5 = vmul.f32 %v4434_v32, %v1817_v40 }
 0x387   : > { %v1890_v53 = vadd.f32 %v1794_v36, %v1666_v46  ;;  %v1815_v8 = vmul.f32 0.6931472, %v3178_v21  ;;  %v4496_v25 = vpop.eup %3179  ;;  %v2617_v6 = vadd.f32 -0.6931472, %v1892_v59  ;;  %v1826_v48 = vadd.f32 1.0, %v1825_v31 }
 0x388   : > { %v4500_v10 = vpop.eup %3181  ;;  %v2616_v28 = vadd.f32 -0.6931472, %v1891_v12  ;;  %vm4503_vm9 = vcmp.lt.f32.partialorder %v1819_v16, 0.0004427343  ;;  %v1828_v0 = vand.u32 2147483647, %v4451_v42  ;;  %v1839_v33 = vsel %vm4491_vm8, %v1836_v15, %v1833_v23 }
 0x389   : > { %v2615_v38 = vadd.f32 -0.6931472, %v1890_v53  ;;  %v1821_v55 = vsel %vm4503_vm9, %v1818_v5, %v1815_v8  ;;  %v1849_v60 = vadd.f32 1.0, %v4496_v25  ;;  %v1845_v62 = vmul.f32 %v4448_v57, %v1844_v52 }
 0x38a   : > { %v1867_v58 = vadd.f32 1.0, %v4500_v10  ;;  %v1920_v35 = vpack.c.bf16 %v2617_v6, %v2616_v28  ;;  %vm1847_vm10 = vcmp.lt.f32.partialorder %v1846_v43, 0.0004427343  ;;  %v1670_v30 = vmax.f32 %v4375_v27, 0.0 }
 0x38b   : > { %v1919_v3 = vpack.c.bf16 %v2615_v38, %v2614_v49  ;;  %v1827_v31 = vmul.f32 %v4451_v42, %v1826_v48  ;;  %v1895_v21 = vadd.f32 %v1839_v33, %v1671_v61  ;;  %v1893_v12 = vadd.f32 %v1821_v55, %v1669_v11 }
 0x38c   : > { %vm1829_vm11 = vcmp.lt.f32.partialorder %v1828_v0, 0.0004427343  ;;  %3191 = vlog2.f32 %v1849_v60  ;;  %v1852_v22 = vmul.f32 -0.5, %v4496_v25  ;;  %v1855_v46 = vand.u32 2147483647, %v4496_v25 }
 0x38d   : > { %2835 = vmatprep.mubr.bf16.mxu1 %v1919_v3  ;;  %3193 = vlog2.f32 %v1867_v58  ;;  %v2618_v53 = vadd.f32 -0.6931472, %v1893_v12  ;;  %v2620_v17 = vadd.f32 -0.6931472, %v1895_v21  ;;  %v1873_v0 = vand.u32 2147483647, %v4500_v10 }
 0x38e   : > { %2836 = vmatmul.mubr.bf16.gmra.mxu1 %v1920_v35  ;;  %v1853_v49 = vadd.f32 1.0, %v1852_v22  ;;  %vm1856_vm13 = vcmp.lt.f32.partialorder %v1855_v46, 0.0004427343  ;;  %v1673_v21 = vmax.f32 %v4412_v29, 0.0  ;;  %v1675_v12 = vmax.f32 %v4404_v56, 0.0 }
 0x38f   : > { %v3184_v26 = vpop.eup %3183  ;;  %vm1874_vm14 = vcmp.lt.f32.partialorder %v1873_v0, 0.0004427343  ;;  %v4536_v56 = vld [vmem:[%s4823_s4 + $0x1] ss:$0 sm:$0xff] }
 0x390   : > { %v3186_v59 = vpop.eup %3185  ;;  %v1842_v32 = vmul.f32 0.6931472, %v3184_v26  ;;  %v1854_v3 = vmul.f32 %v4496_v25, %v1853_v49 }
 0x391   : > { %v1824_v40 = vmul.f32 0.6931472, %v3186_v59  ;;  %v3188_v24 = vpop.eup %3187 }
 0x392   : > { %v1848_v36 = vsel %vm1847_vm10, %v1845_v62, %v1842_v32  ;;  %v1876_v27 = vadd.f32 1.0, %v3188_v24  ;;  %v3190_v61 = vpop.eup %3189  ;;  %v1879_v6 = vmul.f32 -0.5, %v3188_v24  ;;  %v1882_v38 = vand.u32 2147483647, %v3188_v24 }
 0x393   : > { %v1896_v57 = vadd.f32 %v1848_v36, %v1672_v13  ;;  %v1830_v19 = vsel %vm1829_vm11, %v1827_v31, %v1824_v40  ;;  %v1858_v20 = vadd.f32 1.0, %v3190_v61  ;;  %v1870_v13 = vmul.f32 -0.5, %v4500_v10 }
 0x394   : > { %v1894_v16 = vadd.f32 %v1830_v19, %v1670_v30  ;;  %3195 = vlog2.f32 %v1876_v27  ;;  %v1880_v52 = vadd.f32 1.0, %v1879_v6  ;;  %v1861_v5 = vmul.f32 -0.5, %v3190_v61 }
 0x395   : > { %v2621_v42 = vadd.f32 -0.6931472, %v1896_v57  ;;  %3197 = vlog2.f32 %v1858_v20  ;;  %v1871_v28 = vadd.f32 1.0, %v1870_v13  ;;  %vm1883_vm12 = vcmp.lt.f32.partialorder %v1882_v38, 0.0004427343 }
 0x396   : > { %v2619_v23 = vadd.f32 -0.6931472, %v1894_v16  ;;  %v1881_v60 = vmul.f32 %v3188_v24, %v1880_v52  ;;  %v1862_v59 = vadd.f32 1.0, %v1861_v5  ;;  %v1864_v58 = vand.u32 2147483647, %v3190_v61 }
 0x397   : > { %v1922_v11 = vpack.c.bf16 %v2621_v42, %v2620_v17  ;;  %v1872_v32 = vmul.f32 %v4500_v10, %v1871_v28  ;;  %v1676_v30 = vmax.f32 %v4432_v4, 0.0  ;;  %v1674_v19 = vmax.f32 %v4456_v14, 0.0 }
 0x398   : > { %v1921_v8 = vpack.c.bf16 %v2619_v23, %v2618_v53  ;;  %v1863_v25 = vmul.f32 %v3190_v61, %v1862_v59  ;;  %vm1865_vm15 = vcmp.lt.f32.partialorder %v1864_v58, 0.0004427343 }
 0x399   : > { %v3192_v15 = vpop.eup %3191 }
 0x39a   : > { %2839 = vmatprep.mubr.bf16.mxu1 %v1921_v8  ;;  %v3194_v43 = vpop.eup %3193  ;;  %v1851_v26 = vmul.f32 0.6931472, %v3192_v15 }
 0x39b   : > { %2840 = vmatmul.mubr.bf16.gmra.mxu1 %v1922_v11  ;;  %v1869_v55 = vmul.f32 0.6931472, %v3194_v43 }
 0x39c   : > { %v1857_v35 = vsel %vm1856_vm13, %v1854_v3, %v1851_v26 }
 0x39d   : > { %v1875_v31 = vsel %vm1874_vm14, %v1872_v32, %v1869_v55  ;;  %v1897_v57 = vadd.f32 %v1857_v35, %v1673_v21 }
 0x39e   : > { %v1899_v10 = vadd.f32 %v1875_v31, %v1675_v12 }
 0x39f   : > { %v2622_v53 = vadd.f32 -0.6931472, %v1897_v57 }
 0x3a0   : > { %v2624_v4 = vadd.f32 -0.6931472, %v1899_v10 }
 0x3a1   : > { %v3196_v48 = vpop.eup %3195 }
 0x3a2   : > { %v1878_v33 = vmul.f32 0.6931472, %v3196_v48  ;;  %v3198_v40 = vpop.eup %3197 }
 0x3a3   : > { %v1860_v36 = vmul.f32 0.6931472, %v3198_v40 }
 0x3a4   : > { %v1884_v62 = vsel %vm1883_vm12, %v1881_v60, %v1878_v33 }
 0x3a5   : > { %v1900_v24 = vadd.f32 %v1884_v62, %v1676_v30  ;;  %v1866_v27 = vsel %vm1865_vm15, %v1863_v25, %v1860_v36 }
 0x3a6   : > { %v1898_v16 = vadd.f32 %v1866_v27, %v1674_v19 }
 0x3a7   : > { %v2625_v42 = vadd.f32 -0.6931472, %v1900_v24 }
 0x3a8   : > { %v2623_v23 = vadd.f32 -0.6931472, %v1898_v16 }
 0x3a9   : > { %v1924_v8 = vpack.c.bf16 %v2625_v42, %v2624_v4 }
 0x3aa   : > { %v1923_v17 = vpack.c.bf16 %v2623_v23, %v2622_v53 }
 0x3ac   : > { %2843 = vmatprep.mubr.bf16.mxu1 %v1923_v17 }
 0x3ad   : > { %2844 = vmatmul.mubr.bf16.gmra.mxu1 %v1924_v8 }
 0x43a   : > { %v2833_v29 = vpop.f32.mrf.mxu1 }
 0x43b   : > { %v2072_v14 = vadd.f32 %v2833_v29, %v4054_v63 }
 0x43c   : > { %v2007_v61 = vpop.f32.mrf.mxu1 }
 0x43d   : > { %v4540_v20 = vadd.f32 %v4536_v56, %v2072_v14  ;;  %v2070_v11 = vadd.f32 %v2007_v61, %v4059_v47 }
 0x43e   : > { %v2834_v6 = vpop.f32.mrf.mxu1 }
 0x43f   : > { %v2124_v22 = vand.u32 2147483647, %v4540_v20  ;;  %v4545_v13 = vadd.f32 %v4536_v56, %v2070_v11  ;;  %v2073_v15 = vadd.f32 %v2834_v6, %v4064_v7 }
 0x440   : > { %v2010_v52 = vpop.f32.mrf.mxu1 }
 0x441   : > { %v2140_v43 = vsub.f32 0.0, %v2124_v22  ;;  %v2122_v49 = vand.u32 2147483647, %v4545_v13  ;;  %v4550_v63 = vadd.f32 %v4536_v56, %v2073_v15  ;;  %v2071_v38 = vadd.f32 %v2010_v52, %v4069_v44 }
 0x442   : > { %v2108_v15 = vmax.f32 %v4540_v20, 0.0 }
 0x443   : > { %v2158_v5 = vmul.f32 1.442695, %v2140_v43  ;;  %v2138_v48 = vsub.f32 0.0, %v2122_v49  ;;  %v2125_v47 = vand.u32 2147483647, %v4550_v63  ;;  %v4555_v28 = vadd.f32 %v4536_v56, %v2071_v38 }
 0x445   : > { %3199 = vpow2.f32 %v2158_v5  ;;  %v2154_v46 = vmul.f32 1.442695, %v2138_v48  ;;  %v2141_v0 = vsub.f32 0.0, %v2125_v47  ;;  %v2123_v7 = vand.u32 2147483647, %v4555_v28 }
 0x447   : > { %3201 = vpow2.f32 %v2154_v46  ;;  %v2160_v26 = vmul.f32 1.442695, %v2141_v0  ;;  %v2139_v33 = vsub.f32 0.0, %v2123_v7 }
 0x449   : > { %3203 = vpow2.f32 %v2160_v26  ;;  %v2156_v55 = vmul.f32 1.442695, %v2139_v33 }
 0x44b   : > { %3205 = vpow2.f32 %v2156_v55 }
 0x44e   : > { %v2837_v44 = vpop.f32.mrf.mxu1 }
 0x44f   : > { %v2076_v3 = vadd.f32 %v2837_v44, %v4075_v37 }
 0x450   : > { %v2023_v62 = vpop.f32.mrf.mxu1 }
 0x451   : > { %v4562_v58 = vadd.f32 %v4536_v56, %v2076_v3  ;;  %v2074_v35 = vadd.f32 %v2023_v62, %v4078_v2 }
 0x452   : > { %v3200_v60 = vpop.eup %3199  ;;  %v2838_v30 = vpop.f32.mrf.mxu1 }
 0x453   : > { %v2204_v59 = vadd.f32 1.0, %v3200_v60  ;;  %v2128_v21 = vand.u32 2147483647, %v4562_v58  ;;  %v4570_v12 = vadd.f32 %v4536_v56, %v2074_v35  ;;  %v2077_v37 = vadd.f32 %v2838_v30, %v4083_v51 }
 0x454   : > { %v4559_v32 = vpop.eup %3201  ;;  %v2026_v24 = vpop.f32.mrf.mxu1  ;;  %v2207_v57 = vmul.f32 -0.5, %v3200_v60  ;;  %v2210_v10 = vand.u32 2147483647, %v3200_v60 }
 0x455   : > { %3207 = vlog2.f32 %v2204_v59  ;;  %v2186_v40 = vadd.f32 1.0, %v4559_v32  ;;  %v2144_v36 = vsub.f32 0.0, %v2128_v21  ;;  %v2126_v25 = vand.u32 2147483647, %v4570_v12 }
 0x456   : > { %v4566_v31 = vpop.eup %3203  ;;  %v4575_v2 = vadd.f32 %v4536_v56, %v2077_v37  ;;  %v2075_v19 = vadd.f32 %v2026_v24, %v4089_v54  ;;  %v2189_v17 = vmul.f32 -0.5, %v4559_v32  ;;  %v2208_v14 = vadd.f32 1.0, %v2207_v57 }
 0x457   : > { %3209 = vlog2.f32 %v2186_v40  ;;  %v2213_v27 = vadd.f32 1.0, %v4566_v31  ;;  %v2166_v16 = vmul.f32 1.442695, %v2144_v36  ;;  %v2142_v42 = vsub.f32 0.0, %v2126_v25 }
 0x458   : > { %v2129_v53 = vand.u32 2147483647, %v4575_v2  ;;  %v4581_v51 = vadd.f32 %v4536_v56, %v2075_v19  ;;  %v4585_v61 = vpop.eup %3205  ;;  %vm4593_vm0 = vcmp.lt.f32.partialorder %v2210_v10, 0.0004427343  ;;  %v2192_v49 = vand.u32 2147483647, %v4559_v32 }
 0x459   : > { %3211 = vlog2.f32 %v2213_v27  ;;  %v2162_v8 = vmul.f32 1.442695, %v2142_v42  ;;  %v2190_v47 = vadd.f32 1.0, %v2189_v17  ;;  %v2209_v46 = vmul.f32 %v3200_v60, %v2208_v14 }
 0x45a   : > { %3213 = vpow2.f32 %v2166_v16  ;;  %v2145_v29 = vsub.f32 0.0, %v2129_v53  ;;  %v2127_v11 = vand.u32 2147483647, %v4581_v51  ;;  %v2195_v0 = vadd.f32 1.0, %v4585_v61 }
 0x45b   : > { %v2841_v23 = vpop.f32.mrf.mxu1  ;;  %3215 = vpow2.f32 %v2162_v8  ;;  %v2216_v44 = vmul.f32 -0.5, %v4566_v31  ;;  %v2191_v60 = vmul.f32 %v4559_v32, %v2190_v47  ;;  %vm4611_vm1 = vcmp.lt.f32.partialorder %v2192_v49, 0.0004427343  ;;  %v4624_v32 = vld [vmem:[%s4824_s5] ss:$0 sm:$0xff] }
 0x45c   : > { %v2080_v4 = vadd.f32 %v2841_v23, %v4092_v41  ;;  %v2168_v41 = vmul.f32 1.442695, %v2145_v29  ;;  %v2143_v38 = vsub.f32 0.0, %v2127_v11  ;;  %v2106_v10 = vmax.f32 %v4545_v13, 0.0 }
 0x45d   : > { %v2039_v54 = vpop.f32.mrf.mxu1  ;;  %v2217_v25 = vadd.f32 1.0, %v2216_v44  ;;  %v2219_v27 = vand.u32 2147483647, %v4566_v31  ;;  %v2198_v53 = vmul.f32 -0.5, %v4585_v61  ;;  %v2113_v44 = vmax.f32 %v4575_v2, 0.0 }
 0x45e   : > { %v4589_v6 = vadd.f32 %v4536_v56, %v2080_v4  ;;  %v2078_v22 = vadd.f32 %v2039_v54, %v4098_v39  ;;  %3217 = vpow2.f32 %v2168_v41  ;;  %v2164_v26 = vmul.f32 1.442695, %v2143_v38 }
 0x45f   : > { %v2842_v52 = vpop.f32.mrf.mxu1  ;;  %3219 = vlog2.f32 %v2195_v0  ;;  %v2109_v4 = vmax.f32 %v4550_v63, 0.0  ;;  %vm2220_vm2 = vcmp.lt.f32.partialorder %v2219_v27, 0.0004427343  ;;  %v2107_v63 = vmax.f32 %v4555_v28, 0.0 }
 0x460   : > { %v2132_v5 = vand.u32 2147483647, %v4589_v6  ;;  %v4600_v48 = vadd.f32 %v4536_v56, %v2078_v22  ;;  %v2081_v39 = vadd.f32 %v2842_v52, %v4104_v45  ;;  %3221 = vpow2.f32 %v2164_v26 }
 0x461   : > { %v2042_v20 = vpop.f32.mrf.mxu1  ;;  %v2218_v22 = vmul.f32 %v4566_v31, %v2217_v25  ;;  %v2199_v49 = vadd.f32 1.0, %v2198_v53  ;;  %v2201_v38 = vand.u32 2147483647, %v4585_v61  ;;  %v2110_v28 = vmax.f32 %v4570_v12, 0.0 }
 0x462   : > { %v3208_v7 = vpop.eup %3207  ;;  %v2148_v33 = vsub.f32 0.0, %v2132_v5  ;;  %v2130_v55 = vand.u32 2147483647, %v4600_v48  ;;  %v4607_v3 = vadd.f32 %v4536_v56, %v2081_v39  ;;  %v2079_v59 = vadd.f32 %v2042_v20, %v4110_v50 }
 0x463   : > { %v2206_v62 = vmul.f32 0.6931472, %v3208_v7  ;;  %v2112_v20 = vmax.f32 %v4562_v58, 0.0  ;;  %vm4653_vm3 = vcmp.lt.f32.partialorder %v2201_v38, 0.0004427343  ;;  %v2116_v53 = vmax.f32 %v4589_v6, 0.0 }
 0x464   : > { %v2174_v45 = vmul.f32 1.442695, %v2148_v33  ;;  %v3210_v30 = vpop.eup %3209  ;;  %v2146_v40 = vsub.f32 0.0, %v2130_v55  ;;  %v2133_v21 = vand.u32 2147483647, %v4607_v3  ;;  %v4617_v37 = vadd.f32 %v4536_v56, %v2079_v59 }
 0x465   : > { %v2212_v50 = vsel %vm4593_vm0, %v2209_v46, %v2206_v62  ;;  %v2188_v36 = vmul.f32 0.6931472, %v3210_v30  ;;  %v2200_v59 = vmul.f32 %v4585_v61, %v2199_v49  ;;  %vm2417_vm0 = vcmask 7168  }
 0x466   : > { %3223 = vpow2.f32 %v2174_v45  ;;  %v2332_v24 = vadd.f32 %v2212_v50, %v2108_v15  ;;  %v2149_v57 = vsub.f32 0.0, %v2133_v21  ;;  %v2131_v19 = vand.u32 2147483647, %v4617_v37  ;;  %v3212_v23 = vpop.eup %3211 }
 0x467   : > { %v2194_v42 = vsel %vm4611_vm1, %v2191_v60, %v2188_v36  ;;  %v2170_v17 = vmul.f32 1.442695, %v2146_v40  ;;  %v4633_v54 = vpop.eup %3213  ;;  %v2215_v13 = vmul.f32 0.6931472, %v3212_v23 }
 0x468   : > { %v2637_v16 = vadd.f32 -0.6931472, %v2332_v24  ;;  %v2176_v8 = vmul.f32 1.442695, %v2149_v57  ;;  %v2330_v29 = vadd.f32 %v2194_v42, %v2106_v10  ;;  %v2147_v14 = vsub.f32 0.0, %v2131_v19  ;;  %v4638_v52 = vpop.eup %3215 }
 0x469   : > { %v2240_v41 = vadd.f32 1.0, %v4633_v54  ;;  %v2221_v43 = vsel %vm2220_vm2, %v2218_v22, %v2215_v13  ;;  %v2222_v31 = vadd.f32 1.0, %v4638_v52  ;;  %v2243_v0 = vmul.f32 -0.5, %v4633_v54 }
 0x46a   : > { %v2371_v11 = vmul.f32 %v4624_v32, %v2637_v16  ;;  %3225 = vpow2.f32 %v2176_v8  ;;  %v2635_v15 = vadd.f32 -0.6931472, %v2330_v29  ;;  %v2333_v47 = vadd.f32 %v2221_v43, %v2109_v4 }
 0x46b   : > { %3227 = vpow2.f32 %v2170_v17  ;;  %v4644_v39 = vpop.eup %3217  ;;  %v2172_v46 = vmul.f32 1.442695, %v2147_v14  ;;  %v2225_v33 = vmul.f32 -0.5, %v4638_v52  ;;  %v2244_v40 = vadd.f32 1.0, %v2243_v0 }
 0x46c   : > { %2389 = vadd.xlane.f32.xlu1 %v2371_v11  ;;  %v2369_v5 = vmul.f32 %v4624_v32, %v2635_v15  ;;  %3229 = vlog2.f32 %v2240_v41  ;;  %v2638_v7 = vadd.f32 -0.6931472, %v2333_v47  ;;  %v2249_v26 = vadd.f32 1.0, %v4644_v39  ;;  %v3220_v55 = vpop.eup %3219 }
 0x46d   : > { %3231 = vlog2.f32 %v2222_v31  ;;  %v3222_v45 = vpop.eup %3221  ;;  %v2197_v35 = vmul.f32 0.6931472, %v3220_v55  ;;  %v2252_v30 = vmul.f32 -0.5, %v4644_v39  ;;  %v2246_v21 = vand.u32 2147483647, %v4633_v54  ;;  %v2845_v61 = vpop.f32.mrf.mxu1 }
 0x46e   : > { %2385 = vadd.xlane.f32.xlu0 %v2369_v5  ;;  %v2372_v60 = vmul.f32 %v4624_v32, %v2638_v7  ;;  %3233 = vlog2.f32 %v2249_v26  ;;  %v2231_v50 = vadd.f32 1.0, %v3222_v45  ;;  %v2255_v25 = vand.u32 2147483647, %v4644_v39 }
 0x46f   : > { %3235 = vpow2.f32 %v2172_v46  ;;  %v2203_v36 = vsel %vm4653_vm3, %v2200_v59, %v2197_v35  ;;  %v2226_v57 = vadd.f32 1.0, %v2225_v33  ;;  %v2234_v19 = vmul.f32 -0.5, %v3222_v45  ;;  %v2055_v23 = vpop.f32.mrf.mxu1 }
 0x470   : > { %2391 = vadd.xlane.f32.xlu1 %v2372_v60  ;;  %v2084_v10 = vadd.f32 %v2845_v61, %v4130_v34  ;;  %v2331_v27 = vadd.f32 %v2203_v36, %v2107_v63  ;;  %3237 = vlog2.f32 %v2231_v50  ;;  %v2111_v42 = vmax.f32 %v4581_v51, 0.0 }
 0x471   : > { %v2253_v4 = vadd.f32 1.0, %v2252_v30  ;;  %v2228_v17 = vand.u32 2147483647, %v4638_v52  ;;  %v2082_v29 = vadd.f32 %v2055_v23, %v4145_v1  ;;  %v2846_v34 = vpop.f32.mrf.mxu1  ;;  %v2245_v11 = vmul.f32 %v4633_v54, %v2244_v40 }
 0x472   : > { %v4671_v8 = vadd.f32 %v4536_v56, %v2084_v10  ;;  %v2636_v14 = vadd.f32 -0.6931472, %v2331_v27  ;;  %vm4675_vm4 = vcmp.lt.f32.partialorder %v2246_v21, 0.0004427343  ;;  %v2227_v22 = vmul.f32 %v4638_v52, %v2226_v57 }
 0x473   : > { %v4660_v24 = vpop.eup %3223  ;;  %v2237_v15 = vand.u32 2147483647, %v3222_v45  ;;  %v4684_v43 = vadd.f32 %v4536_v56, %v2082_v29  ;;  %v2085_v1 = vadd.f32 %v2846_v34, %v4157_v18  ;;  %vm4687_vm5 = vcmp.lt.f32.partialorder %v2255_v25, 0.0004427343  ;;  %v2058_v38 = vpop.f32.mrf.mxu1 }
 0x474   : > { %v2276_v16 = vadd.f32 1.0, %v4660_v24  ;;  %v2136_v63 = vand.u32 2147483647, %v4671_v8  ;;  %v2235_v54 = vadd.f32 1.0, %v2234_v19  ;;  %v2370_v5 = vmul.f32 %v4624_v32, %v2636_v14 }
 0x475   : > { %vm4692_vm6 = vcmp.lt.f32.partialorder %v2228_v17, 0.0004427343  ;;  %v2279_v47 = vmul.f32 -0.5, %v4660_v24  ;;  %v2134_v18 = vand.u32 2147483647, %v4684_v43  ;;  %v4702_v7 = vadd.f32 %v4536_v56, %v2085_v1 }
 0x476   : > { %3239 = vlog2.f32 %v2276_v16  ;;  %v2152_v0 = vsub.f32 0.0, %v2136_v63  ;;  %v2254_v26 = vmul.f32 %v4644_v39, %v2253_v4  ;;  %v2083_v55 = vadd.f32 %v2058_v38, %v4165_v9  ;;  %2387 = vadd.xlane.f32.xlu0 %v2370_v5 }
 0x477   : > { %v4680_v41 = vpop.eup %3225  ;;  %vm4706_vm7 = vcmp.lt.f32.partialorder %v2237_v15, 0.0004427343  ;;  %v2282_v62 = vand.u32 2147483647, %v4660_v24  ;;  %v2150_v35 = vsub.f32 0.0, %v2134_v18  ;;  %v2236_v40 = vmul.f32 %v3222_v45, %v2235_v54 }
 0x478   : > { %v2285_v31 = vadd.f32 1.0, %v4680_v41  ;;  %v4698_v46 = vpop.eup %3227  ;;  %v2182_v60 = vmul.f32 1.442695, %v2152_v0  ;;  %v2137_v30 = vand.u32 2147483647, %v4702_v7  ;;  %v4713_v50 = vadd.f32 %v4536_v56, %v2083_v55 }
 0x479   : > { %v3230_v33 = vpop.eup %3229  ;;  %v2280_v61 = vadd.f32 1.0, %v2279_v47  ;;  %v2258_v9 = vadd.f32 1.0, %v4698_v46  ;;  %v2178_v25 = vmul.f32 1.442695, %v2150_v35  ;;  %v2288_v56 = vmul.f32 -0.5, %v4680_v41 }
 0x47a   : > { %3241 = vlog2.f32 %v2285_v31  ;;  %v3232_v21 = vpop.eup %3231  ;;  %v2242_v39 = vmul.f32 0.6931472, %v3230_v33  ;;  %v2153_v57 = vsub.f32 0.0, %v2137_v30  ;;  %v2135_v27 = vand.u32 2147483647, %v4713_v50 }
 0x47b   : > { %v3234_v36 = vpop.eup %3233  ;;  %3243 = vpow2.f32 %v2182_v60  ;;  %v2224_v19 = vmul.f32 0.6931472, %v3232_v21  ;;  %vm2283_vm8 = vcmp.lt.f32.partialorder %v2282_v62, 0.0004427343  ;;  %v2261_v0 = vmul.f32 -0.5, %v4698_v46 }
 0x47c   : > { %v4716_v10 = vpop.eup %3235  ;;  %v2248_v45 = vsel %vm4675_vm4, %v2245_v11, %v2242_v39  ;;  %v2251_v16 = vmul.f32 0.6931472, %v3234_v36  ;;  %3245 = vpow2.f32 %v2178_v25  ;;  %v2184_v23 = vmul.f32 1.442695, %v2153_v57 }
 0x47d   : > { %v2336_v4 = vadd.f32 %v2248_v45, %v2112_v20  ;;  %v2230_v17 = vsel %vm4692_vm6, %v2227_v22, %v2224_v19  ;;  %v3238_v29 = vpop.eup %3237  ;;  %v2151_v14 = vsub.f32 0.0, %v2135_v27  ;;  %3247 = vlog2.f32 %v2258_v9 }
 0x47e   : > { %v2257_v34 = vsel %vm4687_vm5, %v2254_v26, %v2251_v16  ;;  %v2334_v13 = vadd.f32 %v2230_v17, %v2110_v28  ;;  %3249 = vpow2.f32 %v2184_v23  ;;  %v2233_v63 = vmul.f32 0.6931472, %v3238_v29 }
 0x47f   : > { %v2641_v11 = vadd.f32 -0.6931472, %v2336_v4  ;;  %v2337_v15 = vadd.f32 %v2257_v34, %v2113_v44  ;;  %v2180_v20 = vmul.f32 1.442695, %v2151_v14  ;;  %v2281_v22 = vmul.f32 %v4660_v24, %v2280_v61 }
 0x480   : > { %v2639_v1 = vadd.f32 -0.6931472, %v2334_v13  ;;  %v2267_v54 = vadd.f32 1.0, %v4716_v10  ;;  %v2239_v12 = vsel %vm4706_vm7, %v2236_v40, %v2233_v63  ;;  %v2289_v44 = vadd.f32 1.0, %v2288_v56 }
 0x481   : > { %v2375_v49 = vmul.f32 %v4624_v32, %v2641_v11  ;;  %v2642_v38 = vadd.f32 -0.6931472, %v2337_v15  ;;  %3251 = vpow2.f32 %v2180_v20  ;;  %v2335_v2 = vadd.f32 %v2239_v12, %v2111_v42 }
 0x482   : > { %v2291_v24 = vand.u32 2147483647, %v4680_v41  ;;  %3253 = vlog2.f32 %v2267_v54  ;;  %v2373_v51 = vmul.f32 %v4624_v32, %v2639_v1  ;;  %v2290_v33 = vmul.f32 %v4680_v41, %v2289_v44 }
 0x483   : > { %v3240_v58 = vpop.eup %3239  ;;  %2397 = vadd.xlane.f32.xlu0 %v2375_v49  ;;  %v2376_v5 = vmul.f32 %v4624_v32, %v2642_v38  ;;  %v2640_v47 = vadd.f32 -0.6931472, %v2335_v2  ;;  %v2117_v55 = vmax.f32 %v4607_v3, 0.0  ;;  %v2262_v6 = vadd.f32 1.0, %v2261_v0 }
 0x484   : > { %v2278_v28 = vmul.f32 0.6931472, %v3240_v58  ;;  %vm2292_vm9 = vcmp.lt.f32.partialorder %v2291_v24, 0.0004427343  ;;  %v2270_v40 = vmul.f32 -0.5, %v4716_v10  ;;  %v2114_v36 = vmax.f32 %v4600_v48, 0.0 }
 0x485   : > { %2399 = vadd.xlane.f32.xlu1 %v2376_v5  ;;  %v2374_v59 = vmul.f32 %v4624_v32, %v2640_v47  ;;  %v2263_v57 = vmul.f32 %v4698_v46, %v2262_v6  ;;  %v2273_v16 = vand.u32 2147483647, %v4716_v10  ;;  %v2115_v34 = vmax.f32 %v4617_v37, 0.0 }
 0x486   : > { %v2284_v52 = vsel %vm2283_vm8, %v2281_v22, %v2278_v28  ;;  %v2271_v27 = vadd.f32 1.0, %v2270_v40  ;;  %v2120_v2 = vmax.f32 %v4671_v8, 0.0  ;;  %v2118_v0 = vmax.f32 %v4684_v43, 0.0 }
 0x487   : > { %v2340_v31 = vadd.f32 %v2284_v52, %v2116_v53  ;;  %v3242_v18 = vpop.eup %3241  ;;  %2393 = vadd.xlane.f32.xlu0 %v2373_v51  ;;  %v2264_v53 = vand.u32 2147483647, %v4698_v46  ;;  %vm2274_vm11 = vcmp.lt.f32.partialorder %v2273_v16, 0.0004427343  ;;  %v2119_v43 = vmax.f32 %v4713_v50, 0.0 }
 0x488   : > { %v2287_v26 = vmul.f32 0.6931472, %v3242_v18  ;;  %v3244_v62 = vpop.eup %3243  ;;  %v2272_v46 = vmul.f32 %v4716_v10, %v2271_v27 }
 0x489   : > { %v2645_v42 = vadd.f32 -0.6931472, %v2340_v31  ;;  %2395 = vadd.xlane.f32.xlu1 %v2374_v59  ;;  %v2312_v21 = vadd.f32 1.0, %v3244_v62  ;;  %v3246_v39 = vpop.eup %3245  ;;  %vm2265_vm10 = vcmp.lt.f32.partialorder %v2264_v53, 0.0004427343  ;;  %v2315_v13 = vmul.f32 -0.5, %v3244_v62 }
 0x48a   : > { %v2293_v60 = vsel %vm2292_vm9, %v2290_v33, %v2287_v26  ;;  %v3248_v41 = vpop.eup %3247  ;;  %v2294_v61 = vadd.f32 1.0, %v3246_v39  ;;  %v2297_v63 = vmul.f32 -0.5, %v3246_v39  ;;  %v2318_v49 = vand.u32 2147483647, %v3244_v62 }
 0x48b   : > { %v2379_v35 = vmul.f32 %v4624_v32, %v2645_v42  ;;  %v2341_v30 = vadd.f32 %v2293_v60, %v2117_v55  ;;  %v3250_v9 = vpop.eup %3249  ;;  %v2260_v25 = vmul.f32 0.6931472, %v3248_v41  ;;  %3255 = vlog2.f32 %v2312_v21 }
 0x48c   : > { %3257 = vlog2.f32 %v2294_v61  ;;  %v2321_v56 = vadd.f32 1.0, %v3250_v9  ;;  %v2316_v1 = vadd.f32 1.0, %v2315_v13  ;;  %v2324_v22 = vmul.f32 -0.5, %v3250_v9 }
 0x48d   : > { %2405 = vadd.xlane.f32.xlu0 %v2379_v35  ;;  %v2646_v3 = vadd.f32 -0.6931472, %v2341_v30  ;;  %v2266_v45 = vsel %vm2265_vm10, %v2263_v57, %v2260_v25  ;;  %v2298_v54 = vadd.f32 1.0, %v2297_v63  ;;  %v2300_v12 = vand.u32 2147483647, %v3246_v39 }
 0x48e   : > { %v3252_v23 = vpop.eup %3251  ;;  %v2338_v4 = vadd.f32 %v2266_v45, %v2114_v36  ;;  %3259 = vlog2.f32 %v2321_v56  ;;  %v2317_v5 = vmul.f32 %v3244_v62, %v2316_v1  ;;  %v2325_v52 = vadd.f32 1.0, %v2324_v22 }
 0x48f   : > { %v2380_v19 = vmul.f32 %v4624_v32, %v2646_v3  ;;  %v3254_v17 = vpop.eup %3253  ;;  %v2303_v29 = vadd.f32 1.0, %v3252_v23  ;;  %v2306_v10 = vmul.f32 -0.5, %v3252_v23  ;;  %v2299_v47 = vmul.f32 %v3246_v39, %v2298_v54 }
 0x490   : > { %v2643_v48 = vadd.f32 -0.6931472, %v2338_v4  ;;  %v2269_v14 = vmul.f32 0.6931472, %v3254_v17  ;;  %vm2319_vm12 = vcmp.lt.f32.partialorder %v2318_v49, 0.0004427343  ;;  %v2326_v8 = vmul.f32 %v3250_v9, %v2325_v52 }
 0x491   : > { %2407 = vadd.xlane.f32.xlu1 %v2380_v19  ;;  %3261 = vlog2.f32 %v2303_v29  ;;  %v2327_v31 = vand.u32 2147483647, %v3250_v9  ;;  %vm2301_vm13 = vcmp.lt.f32.partialorder %v2300_v12, 0.0004427343  ;;  %v2307_v51 = vadd.f32 1.0, %v2306_v10 }
 0x492   : > { %v2377_v11 = vmul.f32 %v4624_v32, %v2643_v48  ;;  %v2275_v15 = vsel %vm2274_vm11, %v2272_v46, %v2269_v14  ;;  %v2309_v33 = vand.u32 2147483647, %v3252_v23  ;;  %v2121_v62 = vmax.f32 %v4702_v7, 0.0 }
 0x493   : > { %v2339_v58 = vadd.f32 %v2275_v15, %v2115_v34  ;;  %vm2328_vm14 = vcmp.lt.f32.partialorder %v2327_v31, 0.0004427343  ;;  %v2308_v30 = vmul.f32 %v3252_v23, %v2307_v51 }
 0x494   : > { %2401 = vadd.xlane.f32.xlu0 %v2377_v11  ;;  %vm2310_vm15 = vcmp.lt.f32.partialorder %v2309_v33, 0.0004427343 }
 0x495   : > { %v2644_v20 = vadd.f32 -0.6931472, %v2339_v58 }
 0x497   : > { %v2378_v38 = vmul.f32 %v4624_v32, %v2644_v20 }
 0x498   : > { %v3256_v28 = vpop.eup %3255 }
 0x499   : > { %v3258_v37 = vpop.eup %3257  ;;  %2403 = vadd.xlane.f32.xlu1 %v2378_v38  ;;  %v2314_v44 = vmul.f32 0.6931472, %v3256_v28 }
 0x49a   : > { %v2296_v24 = vmul.f32 0.6931472, %v3258_v37 }
 0x49b   : > { %v2320_v18 = vsel %vm2319_vm12, %v2317_v5, %v2314_v44  ;;  %v3260_v42 = vpop.eup %3259 }
 0x49c   : > { %v2302_v26 = vsel %vm2301_vm13, %v2299_v47, %v2296_v24  ;;  %v2344_v59 = vadd.f32 %v2320_v18, %v2120_v2  ;;  %v2323_v60 = vmul.f32 0.6931472, %v3260_v42 }
 0x49d   : > { %v2342_v55 = vadd.f32 %v2302_v26, %v2118_v0 }
 0x49e   : > { %v3262_v6 = vpop.eup %3261  ;;  %v2329_v40 = vsel %vm2328_vm14, %v2326_v8, %v2323_v60  ;;  %v2649_v41 = vadd.f32 -0.6931472, %v2344_v59 }
 0x49f   : > { %v2647_v53 = vadd.f32 -0.6931472, %v2342_v55  ;;  %v2305_v35 = vmul.f32 0.6931472, %v3262_v6  ;;  %v2345_v21 = vadd.f32 %v2329_v40, %v2121_v62 }
 0x4a0   : > { %v2383_v25 = vmul.f32 %v4624_v32, %v2649_v41 }
 0x4a1   : > { %v2381_v39 = vmul.f32 %v4624_v32, %v2647_v53  ;;  %v2311_v3 = vsel %vm2310_vm15, %v2308_v30, %v2305_v35  ;;  %v2650_v36 = vadd.f32 -0.6931472, %v2345_v21 }
 0x4a2   : > { %v2343_v61 = vadd.f32 %v2311_v3, %v2119_v43 }
 0x4a3   : > { %2409 = vadd.xlane.f32.xlu0 %v2381_v39  ;;  %v2384_v7 = vmul.f32 %v4624_v32, %v2650_v36 }
 0x4a4   : > { %v2648_v9 = vadd.f32 -0.6931472, %v2343_v61 }
 0x4a6   : > { %v2382_v57 = vmul.f32 %v4624_v32, %v2648_v9 }
 0x4a7   : > { %2413 = vadd.xlane.f32.xlu0 %v2383_v25 }
 0x4a8   : > { %2411 = vadd.xlane.f32.xlu1 %v2382_v57 }
 0x4ac   : > { %2415 = vadd.xlane.f32.xlu1 %v2384_v7 }
 0x4f5   : > { %v2390_v32 = vpop.xlane.xlu1 %2389 }
 0x4f6   : > { %2420 = vst.msk [vmem:[%s4772_s16 + $0x10] sm:$0xff] %vm2417_vm0, %v2390_v32 }
 0x4f7   : > { %v2386_v50 = vpop.xlane.xlu0 %2385 }
 0x4f8   : > { %2418 = vst.msk [vmem:[%s4772_s16] sm:$0xff] %vm2417_vm0, %v2386_v50 }
 0x4f9   : > { %v2392_v19 = vpop.xlane.xlu1 %2391 }
 0x4fa   : > { %2421 = vst.msk [vmem:[%s4772_s16 + $0x18] sm:$0xff] %vm2417_vm0, %v2392_v19 }
 0x4ff   : > { %v2388_v27 = vpop.xlane.xlu0 %2387 }
 0x500   : > { %2419 = vst.msk [vmem:[%s4772_s16 + $0x8] sm:$0xff] %vm2417_vm0, %v2388_v27 }
 0x50c   : > { %v2398_v45 = vpop.xlane.xlu0 %2397 }
 0x50d   : > { %2424 = vst.msk [vmem:[%s4772_s16 + $0x30] sm:$0xff] %vm2417_vm0, %v2398_v45 }
 0x50e   : > { %v2400_v16 = vpop.xlane.xlu1 %2399 }
 0x50f   : > { %2425 = vst.msk [vmem:[%s4772_s16 + $0x38] sm:$0xff] %vm2417_vm0, %v2400_v16 }
 0x510   : > { %v2394_v56 = vpop.xlane.xlu0 %2393 }
 0x511   : > { %2422 = vst.msk [vmem:[%s4772_s16 + $0x20] sm:$0xff] %vm2417_vm0, %v2394_v56 }
 0x512   : > { %v2396_v23 = vpop.xlane.xlu1 %2395 }
 0x513   : > { %2423 = vst.msk [vmem:[%s4772_s16 + $0x28] sm:$0xff] %vm2417_vm0, %v2396_v23 }
 0x516   : > { %v2406_v4 = vpop.xlane.xlu0 %2405 }
 0x517   : > { %2428 = vst.msk [vmem:[%s4772_s16 + $0x50] sm:$0xff] %vm2417_vm0, %v2406_v4 }
 0x51a   : > { %v2408_v17 = vpop.xlane.xlu1 %2407 }
 0x51b   : > { %2429 = vst.msk [vmem:[%s4772_s16 + $0x58] sm:$0xff] %vm2417_vm0, %v2408_v17 }
 0x51d   : > { %v2402_v29 = vpop.xlane.xlu0 %2401 }
 0x51e   : > { %2426 = vst.msk [vmem:[%s4772_s16 + $0x40] sm:$0xff] %vm2417_vm0, %v2402_v29 }
 0x522   : > { %v2404_v48 = vpop.xlane.xlu1 %2403 }
 0x523   : > { %2427 = vst.msk [vmem:[%s4772_s16 + $0x48] sm:$0xff] %vm2417_vm0, %v2404_v48 }
 0x52c   : > { %v2410_v14 = vpop.xlane.xlu0 %2409 }
 0x52d   : > { %2430 = vst.msk [vmem:[%s4772_s16 + $0x60] sm:$0xff] %vm2417_vm0, %v2410_v14 }
 0x530   : > { %v2414_v46 = vpop.xlane.xlu0 %2413 }
 0x531   : > { %2432 = vst.msk [vmem:[%s4772_s16 + $0x70] sm:$0xff] %vm2417_vm0, %v2414_v46  ;;  %v2412_v34 = vpop.xlane.xlu1 %2411 }
 0x532   : > { %2431 = vst.msk [vmem:[%s4772_s16 + $0x68] sm:$0xff] %vm2417_vm0, %v2412_v34 }
 0x535   : > { %v2416_v13 = vpop.xlane.xlu1 %2415 }
 0x536   : > { %2433 = vst.msk [vmem:[%s4772_s16 + $0x78] sm:$0xff] %vm2417_vm0, %v2416_v13 }
 0x537 PF: > { %p17_p10 = scmp.ge.s32.totalorder %s3506_s18, 5   ;;  %s4938_s21 = smov %s3389_s22 }
 0x538   : > { %s4939_s22 = smov %s3393_s23  ;;  %s4940_s23 = smov %s3517_s29 }
 0x539   : > { %s4941_s24 = smov %s3506_s18  ;;  %19 = sbr.rel (!%p17_p10) target bundleno = 4 (0x4), region = 94 }
 0x53e   :  { %2456 = vsyncpa [#allocation3], 1 }
 0x53f   :  { %2458 = vsyncpa [#allocation3 + $0x1], 1 }
 0x540   :  { %2459 = vsyncpa [#allocation5], 1 }

</bundles_post_ra>
